<compile_context>
chip_gen: v5e
topology: v5e:2x2
jax: 0.10.0
libtpu: 0.0.40
codegen_flags: <defaults>
</compile_context>

<pallas_src>
import math
import jax
import jax.numpy as jnp
from jax import lax
from jax.experimental import pallas as pl
from jax.experimental.pallas import tpu as pltpu

# Small synthetic sizes consistent with the module.
B, S, SE = 2, 8, 8          # batch, decoder seq, encoder seq
D, NH, FFN = 32, 4, 64      # input_size (= hidden_size), num_heads, ffn_hidden_size
DH = D // NH                # per-head dim
G = B * NH                  # merged (batch*head) group axis
NEG = -1000000.0            # masked_softmax fill value


def decoder_block_kernel(x_ref, enc_ref, vl_ref,                 # (B,S,D), (B,SE,D), (G,1) int32
                         wqkv1_ref, wo1_ref,                     # (D,3D) (Q cols pre-scaled), (D,D)
                         wq2_ref, wkv2_ref, wo2_ref,             # (D,D) pre-scaled, (D,2D), (D,D)
                         w1_ref, b1_ref, w2_ref, b2_ref,         # (D,FFN), (1,FFN), (FFN,D), (1,D)
                         out_ref):                               # (B,S,D)
    x = x_ref[...]          # (B, S, D)
    enc = enc_ref[...]      # (B, SE, D)

    def split_heads(m, seq):
        # (B*seq, D) -> (B*NH, seq, DH). Mirrors MultiHeadAttention._transpose_qkv.
        return m.reshape(B, seq, NH, DH).transpose(0, 2, 1, 3).reshape(G, seq, DH)

    def merge_heads(o, seq):
        # (B*NH, seq, DH) -> (B*seq, D). Mirrors MultiHeadAttention._transpose_output.
        return o.reshape(B, NH, seq, DH).transpose(0, 2, 1, 3).reshape(B * seq, D)

    def attend(q, k, v, wo, mask):
        # q: (G, Sq, DH); k, v: (G, Sk, DH); wo: (D, D).
        # 1/sqrt(DH) is already folded into the Q projection weights (host side).
        s = jnp.einsum('gqd,gkd->gqk', q, k,
                       preferred_element_type=jnp.float32)               # (G, Sq, Sk)
        if mask is not None:
            s = jnp.where(mask, NEG, s)
        m = jnp.max(s, axis=-1, keepdims=True)
        e = jnp.exp(s - m)
        o = jnp.einsum('gqk,gkd->gqd', e, v,
                       preferred_element_type=jnp.float32)               # (G, Sq, DH)
        # Deferred softmax normalization on the tiny (G,Sq,1) row-sum; EUP approx reciprocal.
        o = o * pl.reciprocal(jnp.sum(e, axis=-1, keepdims=True), approx=True)
        # Head merge + output projection (plain lane-dense 2-D matmul).
        return jnp.dot(merge_heads(o, q.shape[1]), wo,
                       preferred_element_type=jnp.float32)               # (B*Sq, D)

    # --- self-attention (eval mode -> no mask) + residual ---
    xf = x.reshape(B * S, D)
    qkv1 = jnp.dot(xf, wqkv1_ref[...], preferred_element_type=jnp.float32)   # (B*S, 3D)
    q1 = split_heads(qkv1[:, 0:D], S)
    k1 = split_heads(qkv1[:, D:2 * D], S)
    v1 = split_heads(qkv1[:, 2 * D:3 * D], S)
    y1f = attend(q1, k1, v1, wo1_ref[...], None) + xf                        # (B*S, D)

    # --- cross-attention with encoder valid-length mask + residual ---
    q2 = split_heads(jnp.dot(y1f, wq2_ref[...],
                             preferred_element_type=jnp.float32), S)
    kv2 = jnp.dot(enc.reshape(B * SE, D), wkv2_ref[...],
                  preferred_element_type=jnp.float32)                        # (B*SE, 2D)
    k2 = split_heads(kv2[:, 0:D], SE)
    v2 = split_heads(kv2[:, D:2 * D], SE)
    key_pos = lax.broadcasted_iota(jnp.int32, (G, 1, SE), 2)
    # Literal PyTorch np.tile semantics: per-group valid length supplied host-side as (G,1).
    mask = key_pos >= vl_ref[...].reshape(G, 1, 1)                           # (G, 1, SE)
    y2f = attend(q2, k2, v2, wo2_ref[...], mask) + y1f                       # (B*S, D)

    # --- position-wise FFN + residual ---
    h1 = jnp.maximum(
        jnp.dot(y2f, w1_ref[...], preferred_element_type=jnp.float32) + b1_ref[...], 0.0)
    ffn = jnp.dot(h1, w2_ref[...], preferred_element_type=jnp.float32) + b2_ref[...]
    out_ref[...] = (ffn + y2f).reshape(B, S, D)


def decoder_block(x, enc, enc_valid, params):
    (wq1, wk1, wv1, wo1, wq2, wk2, wv2, wo2, w1, b1, w2, b2) = params
    scale = 1.0 / math.sqrt(DH)

    # Host-side weight packing: fold the attention scale into the Q projections, fuse Q/K/V
    # (self-attn) and K/V (cross-attn) into single lane-denser matmuls.
    wqkv1 = jnp.concatenate([wq1 * scale, wk1, wv1], axis=1)     # (D, 3D)
    wq2s = wq2 * scale                                           # (D, D)
    wkv2 = jnp.concatenate([wk2, wv2], axis=1)                   # (D, 2D)

    # Literal PyTorch cross-attn masking: np.tile(valid_length, num_heads) over the
    # (batch*head)-flattened scores -> group g = b*NH + h uses valid[g % B].
    idx = (jnp.arange(B)[:, None] * NH + jnp.arange(NH)[None, :]) % B        # (B, NH)
    vl_bh = enc_valid[idx].reshape(G, 1).astype(jnp.int32)                   # (G, 1)

    weights = (wqkv1, wo1, wq2s, wkv2, wo2, w1, b1, w2, b2)
    vmem = pltpu.MemorySpace.VMEM
    fn = pl.pallas_call(
        decoder_block_kernel,
        # Single invocation (grid=()): everything fits comfortably in VMEM at these shapes;
        # collapsing the old 2-step batch grid removes per-step overhead and doubles the
        # sublane occupancy of the projection / FFN matmuls.
        in_specs=[pl.BlockSpec(memory_space=vmem)] * (3 + len(weights)),
        out_specs=pl.BlockSpec(memory_space=vmem),
        out_shape=jax.ShapeDtypeStruct((B, S, D), jnp.float32),
    )
    return fn(x, enc, vl_bh, *weights)


# ----------------------- pure-JAX reference (for verification) -----------------------
def _ref_mha(q_in, kv_in, wq, wk, wv, wo, valid):
    Q = q_in @ wq
    K = kv_in @ wk
    V = kv_in @ wv
    Bq, Sq, _ = Q.shape
    Sk = K.shape[1]
    Qh = Q.reshape(Bq, Sq, NH, DH).transpose(0, 2, 1, 3)
    Kh = K.reshape(Bq, Sk, NH, DH).transpose(0, 2, 1, 3)
    Vh = V.reshape(Bq, Sk, NH, DH).transpose(0, 2, 1, 3)
    scores = jnp.einsum('bhqd,bhkd->bhqk', Qh, Kh) / math.sqrt(DH)
    if valid is not None:
        # Literal PyTorch: np.tile(valid, NH) across the flattened (b*NH) dim.
        idx = (jnp.arange(Bq)[:, None] * NH + jnp.arange(NH)[None, :]) % valid.shape[0]
        vl = valid[idx]                                                      # (B, NH)
        mask = jnp.arange(Sk)[None, None, None, :] >= vl[:, :, None, None]
        scores = jnp.where(mask, NEG, scores)
    w = jax.nn.softmax(scores, axis=-1)
    o = jnp.einsum('bhqk,bhkd->bhqd', w, Vh)
    o = o.transpose(0, 2, 1, 3).reshape(Bq, Sq, D)
    return o @ wo


def _ref_forward(x, enc, enc_valid, params):
    (wq1, wk1, wv1, wo1, wq2, wk2, wv2, wo2, w1, b1, w2, b2) = params
    a1 = _ref_mha(x, x, wq1, wk1, wv1, wo1, None)
    y1 = a1 + x
    a2 = _ref_mha(y1, enc, wq2, wk2, wv2, wo2, enc_valid)
    y2 = a2 + y1
    h = jnp.maximum(y2 @ w1 + b1, 0.0)
    ffn = h @ w2 + b2
    return ffn + y2   # AddNorm.forward never applies its LayerNorm (per the module source)


if __name__ == "__main__":
    key = jax.random.PRNGKey(0)
    keys = jax.random.split(key, 16)

    x = jax.random.normal(keys[0], (B, S, D), dtype=jnp.float32)
    enc_output = jax.random.normal(keys[1], (B, SE, D), dtype=jnp.float32)
    enc_valid_length = jnp.array([5, 8], dtype=jnp.int32)

    def w(k, shape, scale=0.1):
        return (scale * jax.random.normal(k, shape)).astype(jnp.float32)

    params = (
        w(keys[2], (D, D)), w(keys[3], (D, D)), w(keys[4], (D, D)), w(keys[5], (D, D)),   # attn1 Wq,Wk,Wv,Wo
        w(keys[6], (D, D)), w(keys[7], (D, D)), w(keys[8], (D, D)), w(keys[9], (D, D)),   # attn2 Wq,Wk,Wv,Wo
        w(keys[10], (D, FFN)), w(keys[11], (1, FFN)),                                     # FFN1 W,b
        w(keys[12], (FFN, D)), w(keys[13], (1, D)),                                       # FFN2 W,b
    )

    out = decoder_block(x, enc_output, enc_valid_length, params)
    out = jax.block_until_ready(out)

    ref = _ref_forward(x, enc_output, enc_valid_length, params)
    assert out.shape == (B, S, D)
    # 1e-3 tolerance: the only deviation from the pure-f32 reference is the EUP approximate
    # reciprocal used for the deferred softmax normalization.
    assert jnp.allclose(out, ref, rtol=1e-3, atol=1e-3), "mismatch vs JAX reference"

    print("KERNEL_OK")
</pallas_src>

<mosaic_0001>
module attributes {stable_mosaic.version = 11 : i64} {
  func.func @decoder_block_kernel(%arg0: memref<2x8x32xf32, #tpu.memory_space<vmem>>, %arg1: memref<2x8x32xf32, #tpu.memory_space<vmem>>, %arg2: memref<8x1xi32, #tpu.memory_space<vmem>>, %arg3: memref<32x96xf32, #tpu.memory_space<vmem>>, %arg4: memref<32x32xf32, #tpu.memory_space<vmem>>, %arg5: memref<32x32xf32, #tpu.memory_space<vmem>>, %arg6: memref<32x64xf32, #tpu.memory_space<vmem>>, %arg7: memref<32x32xf32, #tpu.memory_space<vmem>>, %arg8: memref<32x64xf32, #tpu.memory_space<vmem>>, %arg9: memref<1x64xf32, #tpu.memory_space<vmem>>, %arg10: memref<64x32xf32, #tpu.memory_space<vmem>>, %arg11: memref<1x32xf32, #tpu.memory_space<vmem>>, %arg12: memref<2x8x32xf32, #tpu.memory_space<vmem>>) attributes {dimension_semantics = [], scalar_prefetch = 0 : i64, scratch_operands = 0 : i64, tpu.core_type = #tpu.core_type<tc>} {
    %c0 = arith.constant 0 : index
    %c0_0 = arith.constant 0 : index
    %c0_1 = arith.constant 0 : index
    %0 = vector.load %arg0[%c0, %c0_0, %c0_1] : memref<2x8x32xf32, #tpu.memory_space<vmem>>, vector<2x8x32xf32>
    %c0_2 = arith.constant 0 : index
    %c0_3 = arith.constant 0 : index
    %c0_4 = arith.constant 0 : index
    %1 = vector.load %arg1[%c0_2, %c0_3, %c0_4] : memref<2x8x32xf32, #tpu.memory_space<vmem>>, vector<2x8x32xf32>
    %2 = vector.shape_cast %0 : vector<2x8x32xf32> to vector<16x32xf32>
    %c0_5 = arith.constant 0 : index
    %c0_6 = arith.constant 0 : index
    %3 = vector.load %arg3[%c0_5, %c0_6] : memref<32x96xf32, #tpu.memory_space<vmem>>, vector<32x96xf32>
    %cst = arith.constant dense<0.000000e+00> : vector<16x96xf32>
    %4 = tpu.matmul %2, %3, %cst {dimension_numbers = #tpu.dot_dimension_numbers<[1], [0], [0], [1], [0, 0, 1, 1], [], []>} : vector<16x32xf32>, vector<32x96xf32>, vector<16x96xf32> -> vector<16x96xf32>
    %5 = vector.extract_strided_slice %4 {offsets = [0, 0], sizes = [16, 32], strides = [1, 1]} : vector<16x96xf32> to vector<16x32xf32>
    %6 = vector.shape_cast %5 : vector<16x32xf32> to vector<2x8x4x8xf32>
    %7 = tpu.transpose %6, [0, 2, 1, 3] : vector<2x8x4x8xf32> -> vector<2x4x8x8xf32>
    %8 = vector.shape_cast %7 : vector<2x4x8x8xf32> to vector<8x8x8xf32>
    %9 = vector.extract_strided_slice %4 {offsets = [0, 32], sizes = [16, 32], strides = [1, 1]} : vector<16x96xf32> to vector<16x32xf32>
    %10 = vector.shape_cast %9 : vector<16x32xf32> to vector<2x8x4x8xf32>
    %11 = tpu.transpose %10, [0, 2, 1, 3] : vector<2x8x4x8xf32> -> vector<2x4x8x8xf32>
    %12 = vector.shape_cast %11 : vector<2x4x8x8xf32> to vector<8x8x8xf32>
    %13 = vector.extract_strided_slice %4 {offsets = [0, 64], sizes = [16, 32], strides = [1, 1]} : vector<16x96xf32> to vector<16x32xf32>
    %14 = vector.shape_cast %13 : vector<16x32xf32> to vector<2x8x4x8xf32>
    %15 = tpu.transpose %14, [0, 2, 1, 3] : vector<2x8x4x8xf32> -> vector<2x4x8x8xf32>
    %16 = vector.shape_cast %15 : vector<2x4x8x8xf32> to vector<8x8x8xf32>
    %c0_7 = arith.constant 0 : index
    %c0_8 = arith.constant 0 : index
    %17 = vector.load %arg4[%c0_7, %c0_8] : memref<32x32xf32, #tpu.memory_space<vmem>>, vector<32x32xf32>
    "tpu.trace_start"() <{level = 10 : i32, message = "gqd,gkd->gqk"}> : () -> ()
    %cst_9 = arith.constant dense<0.000000e+00> : vector<8x8x8xf32>
    %18 = tpu.matmul %8, %12, %cst_9 {dimension_numbers = #tpu.dot_dimension_numbers<[2], [2], [1], [1], [0, 0, 0, 1, 1, 1], [0], [0]>} : vector<8x8x8xf32>, vector<8x8x8xf32>, vector<8x8x8xf32> -> vector<8x8x8xf32>
    "tpu.trace_stop"() : () -> ()
    %cst_10 = arith.constant dense<0xFF800000> : vector<8x8xf32>
    %19 = vector.multi_reduction <maximumf>, %18, %cst_10 [2] : vector<8x8x8xf32> to vector<8x8xf32>
    %20 = vector.shape_cast %19 : vector<8x8xf32> to vector<8x8x1xf32>
    %21 = vector.broadcast %20 : vector<8x8x1xf32> to vector<8x8x8xf32>
    %22 = arith.subf %18, %21 : vector<8x8x8xf32>
    %23 = math.exp %22 : vector<8x8x8xf32>
    "tpu.trace_start"() <{level = 10 : i32, message = "gqk,gkd->gqd"}> : () -> ()
    %cst_11 = arith.constant dense<0.000000e+00> : vector<8x8x8xf32>
    %24 = tpu.matmul %23, %16, %cst_11 {dimension_numbers = #tpu.dot_dimension_numbers<[2], [1], [1], [2], [0, 0, 0, 1, 1, 2], [0], [0]>} : vector<8x8x8xf32>, vector<8x8x8xf32>, vector<8x8x8xf32> -> vector<8x8x8xf32>
    "tpu.trace_stop"() : () -> ()
    %cst_12 = arith.constant dense<0.000000e+00> : vector<8x8xf32>
    %25 = vector.multi_reduction <add>, %23, %cst_12 [2] : vector<8x8x8xf32> to vector<8x8xf32>
    %26 = vector.shape_cast %25 : vector<8x8xf32> to vector<8x8x1xf32>
    %27 = tpu.reciprocal %26 {approx = true} : vector<8x8x1xf32> -> vector<8x8x1xf32>
    %28 = vector.broadcast %27 : vector<8x8x1xf32> to vector<8x8x8xf32>
    %29 = arith.mulf %24, %28 : vector<8x8x8xf32>
    %30 = vector.shape_cast %29 : vector<8x8x8xf32> to vector<2x4x8x8xf32>
    %31 = tpu.transpose %30, [0, 2, 1, 3] : vector<2x4x8x8xf32> -> vector<2x8x4x8xf32>
    %32 = vector.shape_cast %31 : vector<2x8x4x8xf32> to vector<16x32xf32>
    %cst_13 = arith.constant dense<0.000000e+00> : vector<16x32xf32>
    %33 = tpu.matmul %32, %17, %cst_13 {dimension_numbers = #tpu.dot_dimension_numbers<[1], [0], [0], [1], [0, 0, 1, 1], [], []>} : vector<16x32xf32>, vector<32x32xf32>, vector<16x32xf32> -> vector<16x32xf32>
    %34 = arith.addf %33, %2 : vector<16x32xf32>
    %c0_14 = arith.constant 0 : index
    %c0_15 = arith.constant 0 : index
    %35 = vector.load %arg5[%c0_14, %c0_15] : memref<32x32xf32, #tpu.memory_space<vmem>>, vector<32x32xf32>
    %cst_16 = arith.constant dense<0.000000e+00> : vector<16x32xf32>
    %36 = tpu.matmul %34, %35, %cst_16 {dimension_numbers = #tpu.dot_dimension_numbers<[1], [0], [0], [1], [0, 0, 1, 1], [], []>} : vector<16x32xf32>, vector<32x32xf32>, vector<16x32xf32> -> vector<16x32xf32>
    %37 = vector.shape_cast %36 : vector<16x32xf32> to vector<2x8x4x8xf32>
    %38 = tpu.transpose %37, [0, 2, 1, 3] : vector<2x8x4x8xf32> -> vector<2x4x8x8xf32>
    %39 = vector.shape_cast %38 : vector<2x4x8x8xf32> to vector<8x8x8xf32>
    %40 = vector.shape_cast %1 : vector<2x8x32xf32> to vector<16x32xf32>
    %c0_17 = arith.constant 0 : index
    %c0_18 = arith.constant 0 : index
    %41 = vector.load %arg6[%c0_17, %c0_18] : memref<32x64xf32, #tpu.memory_space<vmem>>, vector<32x64xf32>
    %cst_19 = arith.constant dense<0.000000e+00> : vector<16x64xf32>
    %42 = tpu.matmul %40, %41, %cst_19 {dimension_numbers = #tpu.dot_dimension_numbers<[1], [0], [0], [1], [0, 0, 1, 1], [], []>} : vector<16x32xf32>, vector<32x64xf32>, vector<16x64xf32> -> vector<16x64xf32>
    %43 = vector.extract_strided_slice %42 {offsets = [0, 0], sizes = [16, 32], strides = [1, 1]} : vector<16x64xf32> to vector<16x32xf32>
    %44 = vector.shape_cast %43 : vector<16x32xf32> to vector<2x8x4x8xf32>
    %45 = tpu.transpose %44, [0, 2, 1, 3] : vector<2x8x4x8xf32> -> vector<2x4x8x8xf32>
    %46 = vector.shape_cast %45 : vector<2x4x8x8xf32> to vector<8x8x8xf32>
    %47 = vector.extract_strided_slice %42 {offsets = [0, 32], sizes = [16, 32], strides = [1, 1]} : vector<16x64xf32> to vector<16x32xf32>
    %48 = vector.shape_cast %47 : vector<16x32xf32> to vector<2x8x4x8xf32>
    %49 = tpu.transpose %48, [0, 2, 1, 3] : vector<2x8x4x8xf32> -> vector<2x4x8x8xf32>
    %50 = vector.shape_cast %49 : vector<2x4x8x8xf32> to vector<8x8x8xf32>
    %51 = tpu.iota {dimensions = array<i32: 2>} : vector<8x1x8xi32>
    %c0_20 = arith.constant 0 : index
    %c0_21 = arith.constant 0 : index
    %52 = vector.load %arg2[%c0_20, %c0_21] : memref<8x1xi32, #tpu.memory_space<vmem>>, vector<8x1xi32>
    %53 = vector.shape_cast %52 : vector<8x1xi32> to vector<8x1x1xi32>
    %54 = vector.broadcast %53 : vector<8x1x1xi32> to vector<8x1x8xi32>
    %55 = arith.cmpi sge, %51, %54 : vector<8x1x8xi32>
    %c0_22 = arith.constant 0 : index
    %c0_23 = arith.constant 0 : index
    %56 = vector.load %arg7[%c0_22, %c0_23] : memref<32x32xf32, #tpu.memory_space<vmem>>, vector<32x32xf32>
    "tpu.trace_start"() <{level = 10 : i32, message = "gqd,gkd->gqk"}> : () -> ()
    %cst_24 = arith.constant dense<0.000000e+00> : vector<8x8x8xf32>
    %57 = tpu.matmul %39, %46, %cst_24 {dimension_numbers = #tpu.dot_dimension_numbers<[2], [2], [1], [1], [0, 0, 0, 1, 1, 1], [0], [0]>} : vector<8x8x8xf32>, vector<8x8x8xf32>, vector<8x8x8xf32> -> vector<8x8x8xf32>
    %cst_25 = arith.constant -1.000000e+06 : f32
    "tpu.trace_stop"() : () -> ()
    %58 = vector.shape_cast %55 : vector<8x1x8xi1> to vector<8x1x8xi1>
    %59 = vector.broadcast %58 : vector<8x1x8xi1> to vector<8x8x8xi1>
    %60 = vector.broadcast %cst_25 : f32 to vector<8x8x8xf32>
    %61 = arith.select %59, %60, %57 : vector<8x8x8xi1>, vector<8x8x8xf32>
    %cst_26 = arith.constant dense<0xFF800000> : vector<8x8xf32>
    %62 = vector.multi_reduction <maximumf>, %61, %cst_26 [2] : vector<8x8x8xf32> to vector<8x8xf32>
    %63 = vector.shape_cast %62 : vector<8x8xf32> to vector<8x8x1xf32>
    %64 = vector.broadcast %63 : vector<8x8x1xf32> to vector<8x8x8xf32>
    %65 = arith.subf %61, %64 : vector<8x8x8xf32>
    %66 = math.exp %65 : vector<8x8x8xf32>
    "tpu.trace_start"() <{level = 10 : i32, message = "gqk,gkd->gqd"}> : () -> ()
    %cst_27 = arith.constant dense<0.000000e+00> : vector<8x8x8xf32>
    %67 = tpu.matmul %66, %50, %cst_27 {dimension_numbers = #tpu.dot_dimension_numbers<[2], [1], [1], [2], [0, 0, 0, 1, 1, 2], [0], [0]>} : vector<8x8x8xf32>, vector<8x8x8xf32>, vector<8x8x8xf32> -> vector<8x8x8xf32>
    "tpu.trace_stop"() : () -> ()
    %cst_28 = arith.constant dense<0.000000e+00> : vector<8x8xf32>
    %68 = vector.multi_reduction <add>, %66, %cst_28 [2] : vector<8x8x8xf32> to vector<8x8xf32>
    %69 = vector.shape_cast %68 : vector<8x8xf32> to vector<8x8x1xf32>
    %70 = tpu.reciprocal %69 {approx = true} : vector<8x8x1xf32> -> vector<8x8x1xf32>
    %71 = vector.broadcast %70 : vector<8x8x1xf32> to vector<8x8x8xf32>
    %72 = arith.mulf %67, %71 : vector<8x8x8xf32>
    %73 = vector.shape_cast %72 : vector<8x8x8xf32> to vector<2x4x8x8xf32>
    %74 = tpu.transpose %73, [0, 2, 1, 3] : vector<2x4x8x8xf32> -> vector<2x8x4x8xf32>
    %75 = vector.shape_cast %74 : vector<2x8x4x8xf32> to vector<16x32xf32>
    %cst_29 = arith.constant dense<0.000000e+00> : vector<16x32xf32>
    %76 = tpu.matmul %75, %56, %cst_29 {dimension_numbers = #tpu.dot_dimension_numbers<[1], [0], [0], [1], [0, 0, 1, 1], [], []>} : vector<16x32xf32>, vector<32x32xf32>, vector<16x32xf32> -> vector<16x32xf32>
    %77 = arith.addf %76, %34 : vector<16x32xf32>
    %c0_30 = arith.constant 0 : index
    %c0_31 = arith.constant 0 : index
    %78 = vector.load %arg8[%c0_30, %c0_31] : memref<32x64xf32, #tpu.memory_space<vmem>>, vector<32x64xf32>
    %cst_32 = arith.constant dense<0.000000e+00> : vector<16x64xf32>
    %79 = tpu.matmul %77, %78, %cst_32 {dimension_numbers = #tpu.dot_dimension_numbers<[1], [0], [0], [1], [0, 0, 1, 1], [], []>} : vector<16x32xf32>, vector<32x64xf32>, vector<16x64xf32> -> vector<16x64xf32>
    %c0_33 = arith.constant 0 : index
    %c0_34 = arith.constant 0 : index
    %80 = vector.load %arg9[%c0_33, %c0_34] : memref<1x64xf32, #tpu.memory_space<vmem>>, vector<1x64xf32>
    %81 = vector.broadcast %80 : vector<1x64xf32> to vector<16x64xf32>
    %82 = arith.addf %79, %81 : vector<16x64xf32>
    %cst_35 = arith.constant 0.000000e+00 : f32
    %83 = vector.broadcast %cst_35 : f32 to vector<16x64xf32>
    %84 = arith.maximumf %82, %83 : vector<16x64xf32>
    %c0_36 = arith.constant 0 : index
    %c0_37 = arith.constant 0 : index
    %85 = vector.load %arg10[%c0_36, %c0_37] : memref<64x32xf32, #tpu.memory_space<vmem>>, vector<64x32xf32>
    %cst_38 = arith.constant dense<0.000000e+00> : vector<16x32xf32>
    %86 = tpu.matmul %84, %85, %cst_38 {dimension_numbers = #tpu.dot_dimension_numbers<[1], [0], [0], [1], [0, 0, 1, 1], [], []>} : vector<16x64xf32>, vector<64x32xf32>, vector<16x32xf32> -> vector<16x32xf32>
    %c0_39 = arith.constant 0 : index
    %c0_40 = arith.constant 0 : index
    %87 = vector.load %arg11[%c0_39, %c0_40] : memref<1x32xf32, #tpu.memory_space<vmem>>, vector<1x32xf32>
    %88 = vector.broadcast %87 : vector<1x32xf32> to vector<16x32xf32>
    %89 = arith.addf %86, %88 : vector<16x32xf32>
    %90 = arith.addf %89, %77 : vector<16x32xf32>
    %91 = vector.shape_cast %90 : vector<16x32xf32> to vector<2x8x32xf32>
    %c0_41 = arith.constant 0 : index
    %c0_42 = arith.constant 0 : index
    %c0_43 = arith.constant 0 : index
    %92 = vector.load %arg12[%c0_41, %c0_42, %c0_43] : memref<2x8x32xf32, #tpu.memory_space<vmem>>, vector<2x8x32xf32>
    tpu.vector_store %arg12[%c0_41, %c0_42, %c0_43], %91 {strides = array<i32>} : memref<2x8x32xf32, #tpu.memory_space<vmem>>, vector<2x8x32xf32>,
    return
  }
}

</mosaic_0001>

<bundles_post_ra>
// kernel: tpu_custom_call.1
= control target key start
LH: loop header
LB: loop body
LE: loop exit
PB: predicated region body
PF: predicated region fallthrough
CT: control target
= control target key end

     0   :  { %17 = vsyncpa [#allocation3], 0  ;;  %s4900_s0 = inlined_call_operand.hbm [shape: f32[2,8,32], index: 0, kind: input, shape index: {}]   ;;  %s4901_s1 = inlined_call_operand.hbm [shape: f32[2,8,32], index: 1, kind: input, shape index: {}]   ;;  %s4902_s2 = inlined_call_operand.vmem [shape: s32[8,1], index: 2, kind: input, shape index: {}]   ;;  %s4903_s3 = inlined_call_operand.vmem [shape: f32[32,96], index: 3, kind: input, shape index: {}]   ;;  %s4904_s4 = inlined_call_operand.vmem [shape: f32[32,32], index: 4, kind: input, shape index: {}]   ;;  %s4905_s5 = inlined_call_operand.vmem [shape: f32[32,32], index: 5, kind: input, shape index: {}]   ;;  %s4906_s6 = inlined_call_operand.hbm [shape: f32[32,64], index: 6, kind: input, shape index: {}]   ;;  %s4907_s7 = inlined_call_operand.hbm [shape: f32[32,32], index: 7, kind: input, shape index: {}]   ;;  %s4908_s8 = inlined_call_operand.hbm [shape: f32[32,64], index: 8, kind: input, shape index: {}]   ;;  %s4909_s9 = inlined_call_operand.vmem [shape: f32[1,64], index: 9, kind: input, shape index: {}]   ;;  %s4910_s10 = inlined_call_operand.vmem [shape: f32[64,32], index: 10, kind: input, shape index: {}]   ;;  %s4911_s11 = inlined_call_operand.vmem [shape: f32[1,32], index: 11, kind: input, shape index: {}]   ;;  %s4912_s12 = inlined_call_operand.hbm [shape: f32[2,8,32], index: 12, kind: output, shape index: {}]  }
   0x1   :  { %18 = vsyncpa [#allocation6], 0 }
   0x2   :  { %19 = vsyncpa [#allocation9], 0 }
   0x3   :  { %20 = vsyncpa [#allocation4], 0  ;;  %s38_s23 = sshll.u32 %s4901_s1, 4  ;;  %s3729_s24 = smov [#allocation5]   ;;  %s39_s23 = int_to_ptr.hbm [resolvable:$true] %s38_s23 }
   0x4   :  { %s40_s25 = sshll.u32 %s3729_s24, 4  ;;  %s72_s28 = sshll.u32 %s4907_s7, 4  ;;  %s41_s25 = int_to_ptr.vmem [resolvable:$true] %s40_s25  ;;  %s73_s28 = int_to_ptr.hbm [resolvable:$true] %s72_s28 }
   0x5   :  { %s3730_s29 = smov 128   ;;  %s3731_s30 = smov 8  }
   0x6   :  { %46 = dma.hbm_to_vmem [thread:$0]  %s39_s23, 256, %s41_s25, [#allocation6], %s3730_s29, %s3730_s29, %s3731_s30  }
   0x7   :  { %s3732_s13 = smov [#allocation8]   ;;  %s25_s1 = sshll.u32 %s4900_s0, 4  ;;  %s26_s1 = int_to_ptr.hbm [resolvable:$true] %s25_s1 }
   0x8   :  { %s74_s14 = sshll.u32 %s3732_s13, 4  ;;  %s59_s18 = sshll.u32 %s4906_s6, 4  ;;  %s75_s14 = int_to_ptr.vmem [resolvable:$true] %s74_s14  ;;  %s60_s18 = int_to_ptr.hbm [resolvable:$true] %s59_s18 }
   0x9   :  { %80 = dma.hbm_to_vmem [thread:$0]  %s73_s28, 512, %s75_s14, [#allocation9], %s3730_s29, %s3730_s29, %s3731_s30  }
   0xa   :  { %s3733_s19 = smov [#allocation2]   ;;  %s3734_s21 = smov [#allocation7]  }
   0xb   :  { %s27_s20 = sshll.u32 %s3733_s19, 4  ;;  %s61_s0 = sshll.u32 %s3734_s21, 4  ;;  %s28_s20 = int_to_ptr.vmem [resolvable:$true] %s27_s20  ;;  %s62_s0 = int_to_ptr.vmem [resolvable:$true] %s61_s0 }
   0xc   :  { %33 = dma.hbm_to_vmem [thread:$0]  %s26_s1, 256, %s28_s20, [#allocation3], %s3730_s29, %s3730_s29, %s3731_s30  }
   0xd   :  { %s85_s24 = sshll.u32 %s4908_s8, 4  ;;  %s3735_s6 = smov [#allocation10]   ;;  %s86_s24 = int_to_ptr.hbm [resolvable:$true] %s85_s24 }
   0xe   :  { %67 = dma.hbm_to_vmem [thread:$0]  %s60_s18, 512, %s62_s0, [#allocation6], %s3730_s29, %s3730_s29, %s3731_s30  }
   0xf   :  { %s87_s25 = sshll.u32 %s3735_s6, 4  ;;  %s88_s25 = int_to_ptr.vmem [resolvable:$true] %s87_s25 }
  0x10   :  { %93 = dma.hbm_to_vmem [thread:$0]  %s86_s24, 512, %s88_s25, [#allocation9], %s3730_s29, %s3730_s29, %s3731_s30  }
  0x11   :  { %3721 = dma.done.wait [#allocation3], 256  }
  0x12   :  { %3722 = vsyncadd [#allocation3], 4294967040 }
  0x13   :  { %3723 = dma.done.wait [#allocation6], 768  }
  0x14   :  { %3724 = vsyncadd [#allocation6], 4294966528 }
  0x15   :  { %3725 = dma.done.wait [#allocation9], 1024  }
  0x16   :  { %3726 = vsyncadd [#allocation9], 4294966272  ;;  %v127_v0 = vld [vmem:[%s4903_s3 + $0x18] sm:$0xff]  ;;  %v126_v1 = vld [vmem:[%s4903_s3 + $0x10] sm:$0xff]  ;;  %vm128_vm0 = vcmask 261120   ;;  %s3736_s1 = smov 104  }
  0x17   :  { %147 = vmatpush.msra.mxu0 %v127_v0  ;;  %v125_v2 = vld [vmem:[%s4903_s3 + $0x8] sm:$0xff]  ;;  %v124_v3 = vld [vmem:[%s4903_s3] sm:$0xff]  ;;  %s3737_s7 = smov 112   ;;  %s3738_s3 = smov 120   ;;  %v3740_v8 = vmov 1983009808  }
  0x18   :  { %v120_v4 = vld [vmem:[#allocation2] sm:$0xff]  ;;  %v121_v5 = vld [vmem:[#allocation2 + $0x8] sm:$0xff]  ;;  %s3739_s17 = smov 96   ;;  %v184_v9 = vunpack.c.l.s4 %v3740_v8  ;;  %vm179_vm1 = vcmask 1047556   ;;  %v3741_v17 = vmov 1934713408  }
  0x19   :  { %148 = vmatpush.msra.mxu0 %v126_v1  ;;  %v208_v18 = vunpack.c.l.s4 %v3741_v17  ;;  %s3742_s18 = smov 64   ;;  %vm891_vm2 = vcmask 64512   ;;  %s3743_s19 = smov 16   ;;  %vm1618_vm3 = vcmask 130048   ;;  %vm1621_vm4 = vcmask 195584  }
  0x1a   :  { %v3879_v15 = vunpack.c.0.s8 %v184_v9  ;;  %s3744_s20 = smov 24   ;;  %vm3331_vm13 = vcmask 523264   ;;  %s3371_s16 = sshll.u32 %s4912_s12, 4  ;;  %s3372_s16 = int_to_ptr.hbm [resolvable:$true] %s3371_s16 }
  0x1b   :  { %149 = vmatpush.msra.mxu0 %v125_v2  ;;  %v3886_v24 = vunpack.c.0.s8 %v208_v18 }
  0x1d   :  { %150 = vmatpush.msra.mxu0 %v124_v3 }
  0x1e   :  { %3386 = vmatmul.msk.f32.vlgmr.msra.gmra.mxu0 %vm128_vm0, %v120_v4 }
  0x26   :  { %3387 = vmatmul.msk.f32.gmra.mxu0 %vm128_vm0, %v121_v5 }
  0x9b   :  { %v3856_v6 = vpop.f32.mrf.mxu0 }
  0x9c   :  { %172 = vrot.lane.b32.xlu1 %v3856_v6, %s3736_s1  ;;  %166 = vrot.lane.b32.xlu0 %v3856_v6, %s3737_s7  ;;  %v181_v14 = vrot.slane %v3856_v6, 4 }
  0xa3   :  { %v3862_v7 = vpop.f32.mrf.mxu0 }
  0xa4   :  { %160 = vrot.lane.b32.xlu0 %v3856_v6, %s3738_s3  ;;  %168 = vrot.lane.b32.xlu2 %v3862_v7, %s3737_s7 }
  0xa5   :  { %162 = vrot.lane.b32.xlu1 %v3862_v7, %s3738_s3 }
  0xac   :  { %399 = vrot.lane.b32.xlu0 %v3856_v6, %s3739_s17  ;;  %174 = vrot.lane.b32.xlu2 %v3862_v7, %s3736_s1 }
  0xfe   :  { %v3883_v21 = vpop.permute.xlu2 %168 }
 0x106   :  { %v175_v44 = vpop.permute.xlu2 %174 }
 0x10e   :  { %v173_v10 = vpop.permute.xlu1 %172  ;;  %v167_v11 = vpop.permute.xlu0 %166 }
 0x10f   :  { %v178_v12 = vrot.slane %v167_v11, 4  ;;  %411 = vrot.lane.b32.xlu0 %v173_v10, %s3739_s17  ;;  %407 = vrot.lane.b32.xlu1 %v167_v11, %s3739_s17  ;;  %v182_v16 = vsel %vm179_vm1, %v167_v11, %v181_v14  ;;  %v191_v20 = vrot.slane %v173_v10, 4  ;;  %v3471_v41 = vpack.i.bf16 %v173_v10, %v167_v11 }
 0x110   :  { %v190_v22 = vperm.slane %v182_v16, %v3879_v15 }
 0x111   :  { %v180_v13 = vsel %vm179_vm1, %v178_v12, %v3856_v6 }
 0x112   :  { %v186_v19 = vperm.slane %v180_v13, %v3879_v15  ;;  %v217_v30 = vrot.slane %v190_v22, 4 }
 0x114   :  { %v205_v27 = vrot.slane %v186_v19, 4 }
 0x116   :  { %v161_v23 = vpop.permute.xlu0 %160 }
 0x117   :  { %v192_v25 = vsel %vm179_vm1, %v191_v20, %v161_v23  ;;  %v193_v26 = vrot.slane %v161_v23, 4  ;;  %403 = vrot.lane.b32.xlu2 %v161_v23, %s3739_s17  ;;  %409 = vrot.lane.b32.xlu0 %v3883_v21, %s3739_s17  ;;  %v163_v43 = vpop.permute.xlu1 %162  ;;  %v3466_v57 = vpack.i.bf16 %v161_v23, %v3856_v6 }
 0x118   :  { %v198_v28 = vperm.slane %v192_v25, %v3879_v15  ;;  %401 = vrot.lane.b32.xlu1 %v3862_v7, %s3739_s17  ;;  %v3476_v61 = vpack.i.bf16 %v163_v43, %v3862_v7 }
 0x119   :  { %v194_v29 = vsel %vm179_vm1, %v173_v10, %v193_v26  ;;  %v235_v26 = vrot.slane %v3883_v21, 4 }
 0x11a   :  { %v202_v31 = vperm.slane %v194_v29, %v3879_v15  ;;  %v203_v32 = vrot.slane %v198_v28, 4  ;;  %v206_v33 = vsel %vm179_vm1, %v198_v28, %v205_v27  ;;  %v247_v27 = vrot.slane %v175_v44, 4 }
 0x11b   :  { %v214_v34 = vperm.slane %v206_v33, %v3886_v24  ;;  %v237_v28 = vrot.slane %v3862_v7, 4  ;;  %v249_v29 = vrot.slane %v163_v43, 4 }
 0x11c   :  { %v204_v35 = vsel %vm179_vm1, %v203_v32, %v186_v19  ;;  %v215_v36 = vrot.slane %v202_v31, 4  ;;  %v218_v37 = vsel %vm179_vm1, %v202_v31, %v217_v30  ;;  %v3481_v19 = vpack.i.bf16 %v175_v44, %v3883_v21 }
 0x11d   :  { %v210_v38 = vperm.slane %v204_v35, %v3886_v24  ;;  %v226_v39 = vperm.slane %v218_v37, %v3886_v24  ;;  %v229_v40 = vrot.slane %v214_v34, 4  ;;  %v236_v30 = vsel %vm179_vm1, %v235_v26, %v3862_v7 }
 0x11e   :  { %v216_v42 = vsel %vm179_vm1, %v215_v36, %v190_v22  ;;  %v238_v31 = vsel %vm179_vm1, %v3883_v21, %v237_v28  ;;  %v248_v32 = vsel %vm179_vm1, %v247_v27, %v163_v43  ;;  %v242_v33 = vperm.slane %v236_v30, %v3879_v15 }
 0x11f   :  { %v222_v45 = vperm.slane %v216_v42, %v3886_v24  ;;  %v227_v46 = vrot.slane %v210_v38, 4  ;;  %v230_v47 = vsel %vm179_vm1, 0.0, %v229_v40  ;;  %v233_v48 = vrot.slane %v226_v39, 4  ;;  %3472 = vrot.lane.b32.xlu0 %v3471_v41, %s3742_s18  ;;  %405 = vrot.lane.b32.xlu2 %v163_v43, %s3739_s17 }
 0x120   :  { %v296_v49 = vrot.slane %v230_v47, 4  ;;  %413 = vrot.lane.b32.xlu1 %v175_v44, %s3739_s17  ;;  %v291_v54 = vsel %vm179_vm1, %v229_v40, %v210_v38  ;;  %v250_v34 = vsel %vm179_vm1, %v175_v44, %v249_v29  ;;  %v246_v35 = vperm.slane %v238_v31, %v3879_v15 }
 0x121   :  { %v234_v50 = vsel %vm179_vm1, 0.0, %v233_v48  ;;  %v228_v52 = vsel %vm179_vm1, 0.0, %v227_v46  ;;  %v231_v53 = vrot.slane %v222_v45, 4  ;;  %v295_v55 = vperm.slane %v291_v54, %v3879_v15 }
 0x122   :  { %v307_v51 = vrot.slane %v234_v50, 4  ;;  %v297_v56 = vsel %vm179_vm1, %v296_v49, %v228_v52  ;;  %v302_v60 = vsel %vm179_vm1, %v233_v48, %v222_v45  ;;  %v254_v36 = vperm.slane %v248_v32, %v3879_v15 }
 0x123   :  { %v232_v58 = vsel %vm179_vm1, 0.0, %v231_v53  ;;  %v301_v59 = vperm.slane %v297_v56, %v3879_v15  ;;  %v306_v62 = vperm.slane %v302_v60, %v3879_v15  ;;  %v315_v0 = vrot.slane %v295_v55, 4 }
 0x124   :  { %v308_v63 = vsel %vm179_vm1, %v307_v51, %v232_v58  ;;  %v258_v37 = vperm.slane %v250_v34, %v3879_v15  ;;  %v261_v38 = vrot.slane %v242_v33, 4  ;;  %v273_v39 = vrot.slane %v246_v35, 4 }
 0x125   :  { %v312_v1 = vperm.slane %v308_v63, %v3879_v15  ;;  %v313_v2 = vrot.slane %v301_v59, 4  ;;  %v316_v3 = vsel %vm179_vm1, %v301_v59, %v315_v0  ;;  %v327_v4 = vrot.slane %v306_v62, 4 }
 0x126   :  { %v324_v5 = vperm.slane %v316_v3, %v3886_v24  ;;  %v259_v40 = vrot.slane %v254_v36, 4  ;;  %v262_v7 = vsel %vm179_vm1, %v254_v36, %v261_v38  ;;  %v271_v41 = vrot.slane %v258_v37, 4 }
 0x127   :  { %3467 = vrot.lane.b32.xlu2 %v3466_v57, %s3742_s18  ;;  %v314_v6 = vsel %vm179_vm1, %v313_v2, %v295_v55  ;;  %v325_v8 = vrot.slane %v312_v1, 4  ;;  %v328_v9 = vsel %vm179_vm1, %v312_v1, %v327_v4  ;;  %v274_v21 = vsel %vm179_vm1, %v258_v37, %v273_v39  ;;  %v400_v4 = vpop.permute.xlu0 %399 }
 0x128   :  { %3477 = vrot.lane.b32.xlu1 %v3476_v61, %s3742_s18  ;;  %v320_v10 = vperm.slane %v314_v6, %v3886_v24  ;;  %v336_v11 = vperm.slane %v328_v9, %v3886_v24  ;;  %v343_v13 = vrot.slane %v324_v5, 4  ;;  %v270_v42 = vperm.slane %v262_v7, %v3886_v24 }
 0x129   :  { %v326_v12 = vsel %vm179_vm1, %v325_v8, %v306_v62  ;;  %v260_v43 = vsel %vm179_vm1, %v259_v40, %v242_v33  ;;  %v282_v44 = vperm.slane %v274_v21, %v3886_v24  ;;  %v272_v45 = vsel %vm179_vm1, %v271_v41, %v246_v35 }
 0x12a   :  { %v332_v14 = vperm.slane %v326_v12, %v3886_v24  ;;  %v339_v16 = vrot.slane %v320_v10, 4  ;;  %v341_v17 = vrot.slane %v336_v11, 4  ;;  %v3933_v18 = vsel %vm179_vm1, %v336_v11, %v343_v13 }
 0x12b   :  { %v266_v46 = vperm.slane %v260_v43, %v3886_v24  ;;  %v285_v47 = vrot.slane %v270_v42, 4  ;;  %v278_v48 = vperm.slane %v272_v45, %v3886_v24  ;;  %v289_v49 = vrot.slane %v282_v44, 4 }
 0x12c   :  { %v337_v20 = vrot.slane %v332_v14, 4  ;;  %v3937_v22 = vsel %vm179_vm1, %v332_v14, %v339_v16  ;;  %v3940_v23 = vsel %vm179_vm1, %v341_v17, %v324_v5 }
 0x12d   :  { %v283_v50 = vrot.slane %v266_v46, 4  ;;  %v286_v51 = vsel %vm179_vm1, 0.0, %v285_v47  ;;  %v287_v52 = vrot.slane %v278_v48, 4  ;;  %v290_v53 = vsel %vm179_vm1, 0.0, %v289_v49 }
 0x12e   :  { %v3944_v25 = vsel %vm179_vm1, %v337_v20, %v320_v10  ;;  %v350_v54 = vrot.slane %v286_v51, 4  ;;  %v361_v56 = vrot.slane %v290_v53, 4  ;;  %v345_v59 = vsel %vm179_vm1, %v285_v47, %v266_v46 }
 0x12f   :  { %v284_v55 = vsel %vm179_vm1, 0.0, %v283_v50  ;;  %v288_v57 = vsel %vm179_vm1, 0.0, %v287_v52  ;;  %v356_v62 = vsel %vm179_vm1, %v289_v49, %v278_v48  ;;  %v349_v0 = vperm.slane %v345_v59, %v3879_v15 }
 0x130   :  { %3482 = vrot.lane.b32.xlu1 %v3481_v19, %s3742_s18  ;;  %v351_v58 = vsel %vm179_vm1, %v350_v54, %v284_v55  ;;  %v362_v60 = vsel %vm179_vm1, %v361_v56, %v288_v57  ;;  %v360_v2 = vperm.slane %v356_v62, %v3879_v15  ;;  %v425_v20 = vrot.slane %v400_v4, 4 }
 0x131   :  { %v355_v63 = vperm.slane %v351_v58, %v3879_v15  ;;  %v366_v1 = vperm.slane %v362_v60, %v3879_v15  ;;  %v369_v5 = vrot.slane %v349_v0, 4 }
 0x132   :  { %v381_v8 = vrot.slane %v360_v2, 4 }
 0x133   :  { %v367_v3 = vrot.slane %v355_v63, 4  ;;  %v379_v6 = vrot.slane %v366_v1, 4  ;;  %v370_v12 = vsel %vm179_vm1, %v355_v63, %v369_v5 }
 0x134   :  { %v382_v13 = vsel %vm179_vm1, %v366_v1, %v381_v8  ;;  %v378_v19 = vperm.slane %v370_v12, %v3886_v24 }
 0x135   :  { %v368_v9 = vsel %vm179_vm1, %v367_v3, %v349_v0  ;;  %v380_v11 = vsel %vm179_vm1, %v379_v6, %v360_v2  ;;  %v390_v27 = vperm.slane %v382_v13, %v3886_v24 }
 0x136   :  { %v374_v14 = vperm.slane %v368_v9, %v3886_v24  ;;  %v386_v17 = vperm.slane %v380_v11, %v3886_v24  ;;  %v397_v38 = vrot.slane %v378_v19, 4 }
 0x137   :  { %v395_v41 = vrot.slane %v390_v27, 4 }
 0x138   :  { %v393_v34 = vrot.slane %v374_v14, 4  ;;  %v391_v37 = vrot.slane %v386_v17, 4  ;;  %v4005_v50 = vsel %vm179_vm1, %v390_v27, %v397_v38 }
 0x139   :  { %v4013_v55 = vsel %vm179_vm1, %v395_v41, %v378_v19 }
 0x13a   :  { %v4000_v46 = vsel %vm179_vm1, %v386_v17, %v393_v34  ;;  %v4010_v54 = vsel %vm179_vm1, %v391_v37, %v374_v14 }
 0x171   :  { %v404_v61 = vpop.permute.xlu2 %403 }
 0x172   :  { %v437_v16 = vrot.slane %v404_v61, 4 }
 0x179   :  { %v3979_v10 = vpop.permute.xlu2 %405 }
 0x17a   :  { %v493_v1 = vrot.slane %v3979_v10, 4 }
 0x181   :  { %v412_v26 = vpop.permute.xlu0 %411  ;;  %v408_v30 = vpop.permute.xlu1 %407 }
 0x182   :  { %v435_v28 = vrot.slane %v412_v26, 4  ;;  %v438_v29 = vsel %vm179_vm1, %v412_v26, %v437_v16  ;;  %v423_v32 = vrot.slane %v408_v30, 4  ;;  %v426_v33 = vsel %vm179_vm1, %v408_v30, %v425_v20  ;;  %v3996_v44 = vpop.permute.xlu2 %3467 }
 0x183   :  { %v446_v31 = vperm.slane %v438_v29, %v3879_v15  ;;  %v434_v36 = vperm.slane %v426_v33, %v3879_v15  ;;  %v3470_v56 = vunpack.i.h.bf16 %v3996_v44  ;;  %v3469_v2 = vunpack.i.l.bf16 %v3996_v44 }
 0x184   :  { %v436_v35 = vsel %vm179_vm1, %v435_v28, %v404_v61  ;;  %v424_v7 = vsel %vm179_vm1, %v423_v32, %v400_v4 }
 0x185   :  { %v442_v39 = vperm.slane %v436_v35, %v3879_v15  ;;  %v459_v40 = vrot.slane %v446_v31, 4  ;;  %v430_v21 = vperm.slane %v424_v7, %v3879_v15  ;;  %v461_v42 = vrot.slane %v434_v36, 4 }
 0x186   :  { %v681_v16 = vrot.slane %v3470_v56, 4  ;;  %v669_v26 = vrot.slane %v3469_v2, 4 }
 0x187   :  { %v447_v43 = vrot.slane %v442_v39, 4  ;;  %v460_v45 = vsel %vm179_vm1, %v459_v40, %v434_v36  ;;  %v449_v47 = vrot.slane %v430_v21, 4  ;;  %v462_v48 = vsel %vm179_vm1, %v446_v31, %v461_v42 }
 0x188   :  { %v466_v49 = vperm.slane %v460_v45, %v3886_v24  ;;  %v470_v52 = vperm.slane %v462_v48, %v3886_v24 }
 0x189   :  { %v448_v51 = vsel %vm179_vm1, %v447_v43, %v430_v21  ;;  %v410_v53 = vpop.permute.xlu0 %409  ;;  %v450_v57 = vsel %vm179_vm1, %v442_v39, %v449_v47 }
 0x18a   :  { %v454_v58 = vperm.slane %v448_v51, %v3886_v24  ;;  %v479_v59 = vrot.slane %v410_v53, 4  ;;  %v402_v60 = vpop.permute.xlu1 %401  ;;  %v458_v61 = vperm.slane %v450_v57, %v3886_v24  ;;  %v475_v62 = vrot.slane %v466_v49, 4 }
 0x18b   :  { %v477_v63 = vrot.slane %v470_v52, 4  ;;  %v481_v0 = vrot.slane %v402_v60, 4 }
 0x18c   :  { %v471_v3 = vrot.slane %v454_v58, 4  ;;  %v480_v4 = vsel %vm179_vm1, %v479_v59, %v402_v60  ;;  %v473_v5 = vrot.slane %v458_v61, 4  ;;  %v476_v19 = vsel %vm179_vm1, 0.0, %v475_v62 }
 0x18d   :  { %v478_v6 = vsel %vm179_vm1, 0.0, %v477_v63  ;;  %v546_v8 = vsel %vm179_vm1, %v477_v63, %v466_v49  ;;  %v482_v9 = vsel %vm179_vm1, %v410_v53, %v481_v0  ;;  %v486_v13 = vperm.slane %v480_v4, %v3879_v15 }
 0x18e   :  { %v4026_v11 = vperm.slane %v546_v8, %v3879_v15  ;;  %v551_v12 = vrot.slane %v478_v6, 4  ;;  %v490_v14 = vperm.slane %v482_v9, %v3879_v15  ;;  %v474_v17 = vsel %vm179_vm1, 0.0, %v473_v5 }
 0x18f   :  { %v535_v20 = vsel %vm179_vm1, %v473_v5, %v454_v58  ;;  %v472_v28 = vsel %vm179_vm1, 0.0, %v471_v3  ;;  %v505_v30 = vrot.slane %v486_v13, 4  ;;  %v540_v32 = vrot.slane %v474_v17, 4 }
 0x190   :  { %v552_v27 = vsel %vm179_vm1, %v551_v12, %v476_v19  ;;  %v4036_v29 = vperm.slane %v535_v20, %v3879_v15  ;;  %v571_v34 = vrot.slane %v4026_v11, 4  ;;  %v517_v35 = vrot.slane %v490_v14, 4 }
 0x191   :  { %v3473_v31 = vpop.permute.xlu0 %3472  ;;  %v4039_v33 = vperm.slane %v552_v27, %v3879_v15  ;;  %v541_v41 = vsel %vm179_vm1, %v540_v32, %v472_v28 }
 0x192   :  { %v3475_v36 = vunpack.i.h.bf16 %v3473_v31  ;;  %v3474_v37 = vunpack.i.l.bf16 %v3473_v31  ;;  %v414_v38 = vpop.permute.xlu1 %413  ;;  %v559_v39 = vrot.slane %v4036_v29, 4  ;;  %v4058_v58 = vperm.slane %v541_v41, %v3879_v15 }
 0x193   :  { %v491_v40 = vrot.slane %v414_v38, 4  ;;  %v494_v7 = vsel %vm179_vm1, %v414_v38, %v493_v1  ;;  %v572_v21 = vsel %vm179_vm1, %v4039_v33, %v571_v34 }
 0x194   :  { %v679_v42 = vrot.slane %v3475_v36, 4  ;;  %v667_v43 = vrot.slane %v3474_v37, 4  ;;  %v670_v44 = vsel %vm179_vm1, %v3474_v37, %v669_v26  ;;  %v682_v45 = vsel %vm179_vm1, %v3475_v36, %v681_v16 }
 0x195   :  { %v678_v47 = vperm.slane %v670_v44, %v3879_v15  ;;  %v690_v48 = vperm.slane %v682_v45, %v3879_v15  ;;  %v492_v49 = vsel %vm179_vm1, %v491_v40, %v3979_v10  ;;  %v502_v51 = vperm.slane %v494_v7, %v3879_v15 }
 0x196   :  { %v668_v52 = vsel %vm179_vm1, %v667_v43, %v3469_v2  ;;  %v680_v53 = vsel %vm179_vm1, %v679_v42, %v3470_v56  ;;  %v498_v57 = vperm.slane %v492_v49, %v3879_v15  ;;  %v560_v49 = vsel %vm179_vm1, %v4058_v58, %v559_v39 }
 0x197   :  { %v674_v59 = vperm.slane %v668_v52, %v3879_v15  ;;  %v686_v60 = vperm.slane %v680_v53, %v3879_v15  ;;  %v703_v61 = vrot.slane %v690_v48, 4  ;;  %v705_v62 = vrot.slane %v678_v47, 4 }
 0x198   :  { %v503_v63 = vrot.slane %v498_v57, 4  ;;  %v506_v10 = vsel %vm179_vm1, %v498_v57, %v505_v30  ;;  %v515_v0 = vrot.slane %v502_v51, 4  ;;  %v518_v1 = vsel %vm179_vm1, %v502_v51, %v517_v35 }
 0x199   :  { %v691_v2 = vrot.slane %v686_v60, 4  ;;  %v693_v3 = vrot.slane %v674_v59, 4  ;;  %v704_v56 = vsel %vm179_vm1, %v703_v61, %v678_v47  ;;  %v706_v4 = vsel %vm179_vm1, %v690_v48, %v705_v62 }
 0x19a   :  { %v710_v5 = vperm.slane %v704_v56, %v3886_v24  ;;  %v714_v6 = vperm.slane %v706_v4, %v3886_v24  ;;  %v504_v8 = vsel %vm179_vm1, %v503_v63, %v486_v13  ;;  %v514_v9 = vperm.slane %v506_v10, %v3886_v24  ;;  %v4070_v12 = vpop.permute.xlu1 %3477 }
 0x19b   :  { %v692_v16 = vsel %vm179_vm1, %v691_v2, %v674_v59  ;;  %v694_v17 = vsel %vm179_vm1, %v686_v60, %v693_v3  ;;  %v510_v19 = vperm.slane %v504_v8, %v3886_v24  ;;  %v516_v20 = vsel %vm179_vm1, %v515_v0, %v490_v14 }
 0x19c   :  { %v4077_v26 = vperm.slane %v692_v16, %v3886_v24  ;;  %v702_v27 = vperm.slane %v694_v17, %v3886_v24  ;;  %v719_v28 = vrot.slane %v710_v5, 4  ;;  %v721_v13 = vrot.slane %v714_v6, 4 }
 0x19d   :  { %v522_v30 = vperm.slane %v516_v20, %v3886_v24  ;;  %v526_v31 = vperm.slane %v518_v1, %v3886_v24  ;;  %v527_v32 = vrot.slane %v510_v19, 4  ;;  %v529_v34 = vrot.slane %v514_v9, 4 }
 0x19e   :  { %v715_v35 = vrot.slane %v4077_v26, 4  ;;  %v4083_v36 = vrot.slane %v702_v27, 4  ;;  %v4086_v14 = vsel %vm179_vm1, 0.0, %v719_v28  ;;  %v4089_v37 = vsel %vm179_vm1, 0.0, %v721_v13 }
 0x19f   :  { %v4092_v38 = vsel %vm179_vm1, %v721_v13, %v710_v5  ;;  %v795_v40 = vrot.slane %v4089_v37, 4  ;;  %v528_v7 = vsel %vm179_vm1, 0.0, %v527_v32  ;;  %v530_v41 = vsel %vm179_vm1, 0.0, %v529_v34 }
 0x1a0   :  { %v4099_v42 = vsel %vm179_vm1, 0.0, %v4083_v36  ;;  %v531_v43 = vrot.slane %v522_v30, 4  ;;  %v533_v44 = vrot.slane %v526_v31, 4  ;;  %v589_v45 = vsel %vm179_vm1, %v529_v34, %v510_v19 }
 0x1a1   :  { %v784_v47 = vrot.slane %v4099_v42, 4  ;;  %v594_v48 = vrot.slane %v530_v41, 4  ;;  %v580_v51 = vperm.slane %v572_v21, %v3886_v24  ;;  %v568_v59 = vperm.slane %v560_v49, %v3886_v24 }
 0x1a2   :  { %v532_v52 = vsel %vm179_vm1, 0.0, %v531_v43  ;;  %v534_v53 = vsel %vm179_vm1, 0.0, %v533_v44  ;;  %v600_v57 = vsel %vm179_vm1, %v533_v44, %v522_v30  ;;  %v3480_v63 = vunpack.i.h.bf16 %v4070_v12  ;;  %v3483_v1 = vpop.permute.xlu1 %3482 }
 0x1a3   :  { %v4111_v60 = vperm.slane %v600_v57, %v3879_v15  ;;  %v605_v61 = vrot.slane %v534_v53, 4  ;;  %v585_v62 = vrot.slane %v580_v51, 4  ;;  %v3479_v10 = vunpack.i.l.bf16 %v4070_v12 }
 0x1a4   :  { %v557_v39 = vrot.slane %v4058_v58, 4  ;;  %v569_v21 = vrot.slane %v4039_v33, 4  ;;  %v587_v0 = vrot.slane %v568_v59, 4  ;;  %v737_v4 = vrot.slane %v3480_v63, 4 }
 0x1a5   :  { %v606_v2 = vsel %vm179_vm1, %v605_v61, %v532_v52  ;;  %v625_v3 = vrot.slane %v4111_v60, 4  ;;  %v586_v56 = vsel %vm179_vm1, %v585_v62, %v568_v59  ;;  %v725_v6 = vrot.slane %v3479_v10, 4 }
 0x1a6   :  { %v610_v5 = vperm.slane %v606_v2, %v3879_v15  ;;  %3392 = vmatpush.xpose.msk.msrb.mxu0 %vm891_vm2, %v586_v56  ;;  %v558_v8 = vsel %vm179_vm1, %v557_v39, %v4036_v29  ;;  %v570_v33 = vsel %vm179_vm1, %v569_v21, %v4026_v11  ;;  %v588_v12 = vsel %vm179_vm1, %v580_v51, %v587_v0 }
 0x1a7   :  { %v564_v58 = vperm.slane %v558_v8, %v3886_v24  ;;  %v576_v9 = vperm.slane %v570_v33, %v3886_v24  ;;  %v3485_v16 = vunpack.i.h.bf16 %v3483_v1  ;;  %v3484_v17 = vunpack.i.l.bf16 %v3483_v1 }
 0x1a8   :  { %v593_v19 = vperm.slane %v589_v45, %v3879_v15  ;;  %v595_v20 = vsel %vm179_vm1, %v594_v48, %v528_v7  ;;  %v626_v27 = vsel %vm179_vm1, %v610_v5, %v625_v3 }
 0x1a9   :  { %v581_v28 = vrot.slane %v576_v9, 4  ;;  %3393 = vmatmul.msk.f32.vlgmr.msrb.gmra.mxu0 %vm891_vm2, %v3940_v23  ;;  %v583_v29 = vrot.slane %v564_v58, 4  ;;  %v735_v11 = vrot.slane %v3485_v16, 4  ;;  %v738_v13 = vsel %vm179_vm1, %v3485_v16, %v737_v4 }
 0x1aa   :  { %v723_v30 = vrot.slane %v3484_v17, 4  ;;  %v726_v31 = vsel %vm179_vm1, %v3484_v17, %v725_v6  ;;  %v746_v32 = vperm.slane %v738_v13, %v3879_v15  ;;  %v599_v34 = vperm.slane %v595_v20, %v3879_v15 }
 0x1ab   :  { %v582_v41 = vsel %vm179_vm1, %v581_v28, %v564_v58  ;;  %v584_v7 = vsel %vm179_vm1, %v576_v9, %v583_v29  ;;  %v734_v43 = vperm.slane %v726_v31, %v3879_v15  ;;  %v736_v44 = vsel %vm179_vm1, %v735_v11, %v3480_v63 }
 0x1ac   :  { %3388 = vmatpush.xpose.msk.msra.mxu1 %vm891_vm2, %v582_v41  ;;  %3390 = vmatpush.xpose.msk.msra.mxu2 %vm891_vm2, %v584_v7  ;;  %v724_v23 = vsel %vm179_vm1, %v723_v30, %v3479_v10  ;;  %v742_v45 = vperm.slane %v736_v44, %v3879_v15  ;;  %v759_v48 = vrot.slane %v746_v32, 4  ;;  %v613_v49 = vrot.slane %v593_v19, 4 }
 0x1ad   :  { %v730_v51 = vperm.slane %v724_v23, %v3879_v15  ;;  %v761_v52 = vrot.slane %v734_v43, 4  ;;  %v634_v53 = vperm.slane %v626_v27, %v3886_v24  ;;  %v611_v57 = vrot.slane %v599_v34, 4 }
 0x1ae   :  { %v747_v59 = vrot.slane %v742_v45, 4  ;;  %v760_v61 = vsel %vm179_vm1, %v759_v48, %v734_v43  ;;  %v614_v62 = vsel %vm179_vm1, %v599_v34, %v613_v49  ;;  %v623_v63 = vrot.slane %v610_v5, 4 }
 0x1af   :  { %3389 = vmatmul.msk.f32.vlgmr.msra.gmra.mxu1 %vm891_vm2, %v3944_v25  ;;  %3391 = vmatmul.msk.f32.vlgmr.msra.gmra.mxu2 %vm891_vm2, %v3937_v22  ;;  %v749_v10 = vrot.slane %v730_v51, 4  ;;  %v762_v39 = vsel %vm179_vm1, %v746_v32, %v761_v52  ;;  %v766_v21 = vperm.slane %v760_v61, %v3886_v24  ;;  %v622_v0 = vperm.slane %v614_v62, %v3886_v24 }
 0x1b0   :  { %3394 = vmatpush.xpose.msk.msrb.mxu1 %vm891_vm2, %v588_v12  ;;  %v748_v1 = vsel %vm179_vm1, %v747_v59, %v730_v51  ;;  %v770_v2 = vperm.slane %v762_v39, %v3886_v24  ;;  %v639_v3 = vrot.slane %v634_v53, 4  ;;  %v612_v56 = vsel %vm179_vm1, %v611_v57, %v593_v19 }
 0x1b1   :  { %v750_v4 = vsel %vm179_vm1, %v742_v45, %v749_v10  ;;  %v754_v25 = vperm.slane %v748_v1, %v3886_v24  ;;  %v775_v5 = vrot.slane %v766_v21, 4  ;;  %v618_v22 = vperm.slane %v612_v56, %v3886_v24 }
 0x1b2   :  { %v758_v6 = vperm.slane %v750_v4, %v3886_v24  ;;  %v777_v8 = vrot.slane %v770_v2, 4  ;;  %v640_v33 = vsel %vm179_vm1, %v639_v3, %v622_v0  ;;  %v624_v58 = vsel %vm179_vm1, %v623_v63, %v4111_v60 }
 0x1b3   :  { %v771_v9 = vrot.slane %v754_v25, 4  ;;  %v776_v12 = vsel %vm179_vm1, 0.0, %v775_v5  ;;  %v630_v16 = vperm.slane %v624_v58, %v3886_v24  ;;  %v641_v17 = vrot.slane %v622_v0, 4 }
 0x1b4   :  { %3400 = vmatpush.xpose.msk.msra.mxu1 %vm891_vm2, %v640_v33  ;;  %v773_v19 = vrot.slane %v758_v6, 4  ;;  %v778_v20 = vsel %vm179_vm1, 0.0, %v777_v8  ;;  %v844_v27 = vsel %vm179_vm1, %v777_v8, %v766_v21  ;;  %v637_v28 = vrot.slane %v618_v22, 4 }
 0x1b5   :  { %v849_v29 = vrot.slane %v778_v20, 4  ;;  %v635_v11 = vrot.slane %v630_v16, 4  ;;  %v642_v13 = vsel %vm179_vm1, %v634_v53, %v641_v17  ;;  %v716_v60 = vsel %vm179_vm1, 0.0, %v715_v35 }
 0x1b6   :  { %v774_v30 = vsel %vm179_vm1, 0.0, %v773_v19  ;;  %v638_v31 = vsel %vm179_vm1, %v630_v16, %v637_v28  ;;  %v779_v32 = vsel %vm179_vm1, %v4083_v36, %v4077_v26  ;;  %v785_v34 = vsel %vm179_vm1, %v784_v47, %v716_v60 }
 0x1b7   :  { %v838_v41 = vrot.slane %v774_v30, 4  ;;  %3395 = vmatmul.msk.f32.vlgmr.msrb.gmra.mxu1 %vm891_vm2, %v3933_v18  ;;  %v636_v7 = vsel %vm179_vm1, %v635_v11, %v618_v22  ;;  %3398 = vmatpush.xpose.msk.msra.mxu3 %vm891_vm2, %v638_v31  ;;  %v783_v35 = vperm.slane %v779_v32, %v3879_v15  ;;  %v789_v43 = vperm.slane %v785_v34, %v3879_v15 }
 0x1b8   :  { %3396 = vmatpush.xpose.msk.msrb.mxu2 %vm891_vm2, %v636_v7  ;;  %v794_v26 = vperm.slane %v4092_v38, %v3879_v15  ;;  %v796_v36 = vsel %vm179_vm1, %v795_v40, %v4086_v14  ;;  %v772_v18 = vsel %vm179_vm1, 0.0, %v771_v9  ;;  %v833_v42 = vsel %vm179_vm1, %v773_v19, %v754_v25 }
 0x1b9   :  { %v800_v47 = vperm.slane %v796_v36, %v3879_v15  ;;  %v803_v44 = vrot.slane %v783_v35, 4  ;;  %v801_v23 = vrot.slane %v789_v43, 4  ;;  %v837_v45 = vperm.slane %v833_v42, %v3879_v15 }
 0x1ba   :  { %v815_v48 = vrot.slane %v794_v26, 4  ;;  %3399 = vmatmul.msk.f32.vlgmr.msra.gmra.mxu3 %vm891_vm2, %v4000_v46  ;;  %v839_v37 = vsel %vm179_vm1, %v838_v41, %v772_v18  ;;  %v848_v14 = vperm.slane %v844_v27, %v3879_v15  ;;  %v850_v38 = vsel %vm179_vm1, %v849_v29, %v776_v12 }
 0x1bb   :  { %v804_v40 = vsel %vm179_vm1, %v789_v43, %v803_v44  ;;  %3397 = vmatmul.msk.f32.vlgmr.msrb.gmra.mxu2 %vm891_vm2, %v4010_v54  ;;  %v802_v49 = vsel %vm179_vm1, %v801_v23, %v783_v35  ;;  %v813_v51 = vrot.slane %v800_v47, 4  ;;  %v843_v52 = vperm.slane %v839_v37, %v3879_v15 }
 0x1bc   :  { %3402 = vmatpush.xpose.msk.msra.mxu2 %vm891_vm2, %v642_v13  ;;  %v812_v53 = vperm.slane %v804_v40, %v3886_v24  ;;  %v816_v46 = vsel %vm179_vm1, %v800_v47, %v815_v48  ;;  %v808_v57 = vperm.slane %v802_v49, %v3886_v24  ;;  %v854_v59 = vperm.slane %v850_v38, %v3879_v15 }
 0x1bd   :  { %v824_v61 = vperm.slane %v816_v46, %v3886_v24  ;;  %v814_v62 = vsel %vm179_vm1, %v813_v51, %v794_v26  ;;  %v857_v63 = vrot.slane %v837_v45, 4  ;;  %v869_v10 = vrot.slane %v848_v14, 4 }
 0x1be   :  { %v820_v54 = vperm.slane %v814_v62, %v3886_v24  ;;  %v827_v39 = vrot.slane %v808_v57, 4  ;;  %v831_v21 = vrot.slane %v812_v53, 4  ;;  %v855_v0 = vrot.slane %v843_v52, 4 }
 0x1bf   :  { %v829_v1 = vrot.slane %v824_v61, 4  ;;  %3401 = vmatmul.msk.f32.vlgmr.msra.gmra.mxu1 %vm891_vm2, %v4013_v55  ;;  %v858_v2 = vsel %vm179_vm1, %v843_v52, %v857_v63  ;;  %v870_v3 = vsel %vm179_vm1, %v854_v59, %v869_v10  ;;  %v867_v56 = vrot.slane %v854_v59, 4 }
 0x1c0   :  { %v825_v4 = vrot.slane %v820_v54, 4  ;;  %v832_v25 = vsel %vm179_vm1, %v824_v61, %v831_v21  ;;  %v828_v5 = vsel %vm179_vm1, %v820_v54, %v827_v39  ;;  %v866_v22 = vperm.slane %v858_v2, %v3886_v24 }
 0x1c1   :  { %v830_v6 = vsel %vm179_vm1, %v829_v1, %v812_v53  ;;  %1235 = vmatpush.msrb.mxu2 %v832_v25  ;;  %1189 = vmatpush.msra.mxu0 %v828_v5  ;;  %v878_v8 = vperm.slane %v870_v3, %v3886_v24  ;;  %v856_v55 = vsel %vm179_vm1, %v855_v0, %v837_v45 }
 0x1c2   :  { %1212 = vmatpush.msrb.mxu1 %v830_v6  ;;  %v826_v33 = vsel %vm179_vm1, %v825_v4, %v808_v57  ;;  %v862_v58 = vperm.slane %v856_v55, %v3886_v24  ;;  %v868_v9 = vsel %vm179_vm1, %v867_v56, %v848_v14  ;;  %v885_v12 = vrot.slane %v866_v22, 4 }
 0x1c3   :  { %1166 = vmatpush.msrb.mxu3 %v826_v33  ;;  %3403 = vmatmul.msk.f32.vlgmr.msra.gmra.mxu2 %vm891_vm2, %v4005_v50  ;;  %v883_v16 = vrot.slane %v878_v8, 4  ;;  %v874_v17 = vperm.slane %v868_v9, %v3886_v24 }
 0x1c4   :  { %v886_v19 = vsel %vm179_vm1, %v878_v8, %v885_v12  ;;  %v881_v20 = vrot.slane %v862_v58, 4 }
 0x1c5   :  { %v884_v27 = vsel %vm179_vm1, %v883_v16, %v866_v22  ;;  %v879_v28 = vrot.slane %v874_v17, 4  ;;  %1327 = vmatpush.msra.mxu2 %v886_v19 }
 0x1c6   :  { %1304 = vmatpush.msra.mxu1 %v884_v27  ;;  %v882_v29 = vsel %vm179_vm1, %v874_v17, %v881_v20 }
 0x1c7   :  { %v880_v11 = vsel %vm179_vm1, %v879_v28, %v862_v58  ;;  %1281 = vmatpush.msrb.mxu0 %v882_v29 }
 0x1c8   :  { %1258 = vmatpush.msra.mxu3 %v880_v11 }
 0x226   :  { %v967_v13 = vpop.f32.mrf.mxu0 }
 0x227   :  { %v1106_v50 = vsel %vm891_vm2, %v967_v13, -inf }
 0x228   :  { %1107 = vmax.xlane.f32.xlu1 %v1106_v50 }
 0x22c   :  { %v915_v60 = vpop.f32.mrf.mxu1 }
 0x22d   :  { %v1100_v30 = vsel %vm891_vm2, %v915_v60, -inf }
 0x22e   :  { %1101 = vmax.xlane.f32.xlu2 %v1100_v30 }
 0x232   :  { %v941_v31 = vpop.f32.mrf.mxu2 }
 0x233   :  { %v1103_v32 = vsel %vm891_vm2, %v941_v31, -inf }
 0x234   :  { %v993_v34 = vpop.f32.mrf.mxu1 }
 0x235   :  { %v1109_v41 = vsel %vm891_vm2, %v993_v34, -inf }
 0x236   :  { %1104 = vmax.xlane.f32.xlu2 %v1103_v32  ;;  %1110 = vmax.xlane.f32.xlu0 %v1109_v41 }
 0x23c   :  { %v1071_v43 = vpop.f32.mrf.mxu1 }
 0x23d   :  { %v1118_v36 = vsel %vm891_vm2, %v1071_v43, -inf  ;;  %v1045_v42 = vpop.f32.mrf.mxu3 }
 0x23e   :  { %v1019_v7 = vpop.f32.mrf.mxu2  ;;  %v1115_v47 = vsel %vm891_vm2, %v1045_v42, -inf }
 0x23f   :  { %v1112_v35 = vsel %vm891_vm2, %v1019_v7, -inf }
 0x240   :  { %1113 = vmax.xlane.f32.xlu2 %v1112_v35 }
 0x246   :  { %v1097_v26 = vpop.f32.mrf.mxu2 }
 0x247   :  { %v1121_v18 = vsel %vm891_vm2, %v1097_v26, -inf }
 0x248   :  { %1119 = vmax.xlane.f32.xlu2 %v1118_v36  ;;  %1122 = vmax.xlane.f32.xlu0 %v1121_v18 }
 0x250   :  { %1116 = vmax.xlane.f32.xlu0 %v1115_v47 }
 0x29b   :  { %v1108_v44 = vpop.xlane.xlu1 %1107 }
 0x29c   :  { %v1126_v23 = vsub.f32 %v967_v13, %v1108_v44 }
 0x29e   :  { %v1136_v45 = vmul.f32 1.442695, %v1126_v23 }
 0x2a0   :  { %3511 = vpow2.f32 %v1136_v45 }
 0x2a1   :  { %v1102_v48 = vpop.xlane.xlu2 %1101 }
 0x2a2   :  { %v1124_v37 = vsub.f32 %v915_v60, %v1102_v48 }
 0x2a4   :  { %v1132_v14 = vmul.f32 1.442695, %v1124_v37 }
 0x2a6   :  { %v3512_v38 = vpop.eup %3511  ;;  %3513 = vpow2.f32 %v1132_v14 }
 0x2a7   :  { %3406 = vmatmul.msk.f32.vlgmr.msrb.gmra.mxu1 %vm891_vm2, %v3512_v38  ;;  %v1338_v40 = vsel %vm891_vm2, %v3512_v38, 0.0 }
 0x2a8   :  { %1339 = vadd.xlane.f32.xlu1 %v1338_v40 }
 0x2a9   :  { %v1105_v49 = vpop.xlane.xlu2 %1104  ;;  %v1111_v51 = vpop.xlane.xlu0 %1110 }
 0x2aa   :  { %v1125_v52 = vsub.f32 %v941_v31, %v1105_v49  ;;  %v1127_v53 = vsub.f32 %v993_v34, %v1111_v51 }
 0x2ac   :  { %v3514_v46 = vpop.eup %3513  ;;  %v1134_v57 = vmul.f32 1.442695, %v1125_v52  ;;  %v1138_v59 = vmul.f32 1.442695, %v1127_v53 }
 0x2ad   :  { %3404 = vmatmul.msk.f32.vlgmr.msrb.gmra.mxu3 %vm891_vm2, %v3514_v46  ;;  %v1332_v61 = vsel %vm891_vm2, %v3514_v46, 0.0 }
 0x2ae   :  { %3515 = vpow2.f32 %v1134_v57  ;;  %1333 = vadd.xlane.f32.xlu2 %v1332_v61 }
 0x2af   :  { %3517 = vpow2.f32 %v1138_v59 }
 0x2b3   :  { %v1114_v62 = vpop.xlane.xlu2 %1113 }
 0x2b4   :  { %v3516_v63 = vpop.eup %3515  ;;  %v1128_v10 = vsub.f32 %v1019_v7, %v1114_v62 }
 0x2b5   :  { %v3518_v54 = vpop.eup %3517  ;;  %3405 = vmatmul.msk.f32.vlgmr.msra.gmra.mxu0 %vm891_vm2, %v3516_v63  ;;  %v1335_v39 = vsel %vm891_vm2, %v3516_v63, 0.0 }
 0x2b6   :  { %3407 = vmatmul.msk.f32.vlgmr.msrb.gmra.mxu2 %vm891_vm2, %v3518_v54  ;;  %v1140_v21 = vmul.f32 1.442695, %v1128_v10  ;;  %1336 = vadd.xlane.f32.xlu1 %v1335_v39  ;;  %v1341_v0 = vsel %vm891_vm2, %v3518_v54, 0.0 }
 0x2b7   :  { %1342 = vadd.xlane.f32.xlu0 %v1341_v0 }
 0x2b8   :  { %3519 = vpow2.f32 %v1140_v21 }
 0x2bb   :  { %v1120_v1 = vpop.xlane.xlu2 %1119  ;;  %v1123_v2 = vpop.xlane.xlu0 %1122 }
 0x2bc   :  { %v1130_v3 = vsub.f32 %v1071_v43, %v1120_v1  ;;  %v1131_v56 = vsub.f32 %v1097_v26, %v1123_v2 }
 0x2be   :  { %v3520_v4 = vpop.eup %3519  ;;  %v1144_v25 = vmul.f32 1.442695, %v1130_v3  ;;  %v1146_v5 = vmul.f32 1.442695, %v1131_v56 }
 0x2bf   :  { %3408 = vmatmul.msk.f32.vlgmr.msra.gmra.mxu3 %vm891_vm2, %v3520_v4  ;;  %v1344_v22 = vsel %vm891_vm2, %v3520_v4, 0.0 }
 0x2c0   :  { %3521 = vpow2.f32 %v1144_v25  ;;  %1345 = vadd.xlane.f32.xlu0 %v1344_v22 }
 0x2c1   :  { %3523 = vpow2.f32 %v1146_v5 }
 0x2c3   :  { %v1117_v6 = vpop.xlane.xlu0 %1116 }
 0x2c4   :  { %v1129_v8 = vsub.f32 %v1045_v42, %v1117_v6 }
 0x2c6   :  { %v3522_v55 = vpop.eup %3521  ;;  %v1142_v33 = vmul.f32 1.442695, %v1129_v8 }
 0x2c7   :  { %v3524_v58 = vpop.eup %3523  ;;  %3410 = vmatmul.msk.f32.vlgmr.msra.gmra.mxu1 %vm891_vm2, %v3522_v55  ;;  %v1350_v9 = vsel %vm891_vm2, %v3522_v55, 0.0 }
 0x2c8   :  { %3525 = vpow2.f32 %v1142_v33  ;;  %3411 = vmatmul.msk.f32.vlgmr.msra.gmra.mxu2 %vm891_vm2, %v3524_v58  ;;  %1351 = vadd.xlane.f32.xlu2 %v1350_v9  ;;  %v1353_v12 = vsel %vm891_vm2, %v3524_v58, 0.0 }
 0x2c9   :  { %1354 = vadd.xlane.f32.xlu1 %v1353_v12 }
 0x2ce   :  { %v3526_v16 = vpop.eup %3525 }
 0x2cf   :  { %3409 = vmatmul.msk.f32.vlgmr.msrb.gmra.mxu0 %vm891_vm2, %v3526_v16  ;;  %v1347_v17 = vsel %vm891_vm2, %v3526_v16, 0.0 }
 0x2d0   :  { %1348 = vadd.xlane.f32.xlu2 %v1347_v17 }
 0x31b   :  { %v1340_v19 = vpop.xlane.xlu1 %1339 }
 0x31c   :  { %3527 = vrcp.f32 %v1340_v19 }
 0x321   :  { %v1334_v20 = vpop.xlane.xlu2 %1333 }
 0x322   :  { %3529 = vrcp.f32 %v1334_v20  ;;  %v3528_v29 = vpop.eup %3527 }
 0x324   :  { %v1214_v28 = vpop.f32.mrf.mxu1 }
 0x325   :  { %v1366_v60 = vmul.f32 %v3528_v29, %v1214_v28 }
 0x327   :  { %v1372_v41 = vrot.slane %v1366_v60, 4 }
 0x328   :  { %v3530_v11 = vpop.eup %3529 }
 0x329   :  { %v1337_v27 = vpop.xlane.xlu1 %1336 }
 0x32a   :  { %3531 = vrcp.f32 %v1337_v27  ;;  %v1343_v13 = vpop.xlane.xlu0 %1342 }
 0x32b   :  { %3533 = vrcp.f32 %v1343_v13 }
 0x330   :  { %v1168_v50 = vpop.f32.mrf.mxu3  ;;  %v3532_v34 = vpop.eup %3531 }
 0x331   :  { %v1364_v30 = vmul.f32 %v3530_v11, %v1168_v50  ;;  %v3534_v26 = vpop.eup %3533 }
 0x332   :  { %v1191_v32 = vpop.f32.mrf.mxu0 }
 0x333   :  { %v1374_v31 = vrot.slane %v1364_v30, 4  ;;  %v1365_v35 = vmul.f32 %v3532_v34, %v1191_v32  ;;  %v1373_v43 = vsel %vm179_vm1, %v1372_v41, %v1364_v30  ;;  %v1346_v18 = vpop.xlane.xlu0 %1345 }
 0x334   :  { %v1379_v47 = vperm.slane %v1373_v43, %v3879_v15  ;;  %3535 = vrcp.f32 %v1346_v18 }
 0x335   :  { %v1375_v7 = vsel %vm179_vm1, %v1366_v60, %v1374_v31  ;;  %v1386_v44 = vrot.slane %v1365_v35, 4 }
 0x336   :  { %v1383_v36 = vperm.slane %v1375_v7, %v3879_v15  ;;  %v1398_v40 = vrot.slane %v1379_v47, 4 }
 0x338   :  { %v1410_v14 = vrot.slane %v1383_v36, 4 }
 0x339   :  { %v1237_v42 = vpop.f32.mrf.mxu2 }
 0x33a   :  { %v1367_v23 = vmul.f32 %v3534_v26, %v1237_v42  ;;  %v3536_v63 = vpop.eup %3535 }
 0x33b   :  { %v1352_v45 = vpop.xlane.xlu2 %1351 }
 0x33c   :  { %v1384_v48 = vrot.slane %v1367_v23, 4  ;;  %v1387_v37 = vsel %vm179_vm1, %v1367_v23, %v1386_v44  ;;  %3537 = vrcp.f32 %v1352_v45  ;;  %v1355_v57 = vpop.xlane.xlu1 %1354 }
 0x33d   :  { %v1395_v38 = vperm.slane %v1387_v37, %v3879_v15  ;;  %3539 = vrcp.f32 %v1355_v57 }
 0x33e   :  { %v1385_v49 = vsel %vm179_vm1, %v1384_v48, %v1365_v35 }
 0x33f   :  { %v1391_v51 = vperm.slane %v1385_v49, %v3879_v15  ;;  %v1408_v52 = vrot.slane %v1395_v38, 4  ;;  %v1411_v53 = vsel %vm179_vm1, %v1395_v38, %v1410_v14 }
 0x340   :  { %v1419_v46 = vperm.slane %v1411_v53, %v3886_v24 }
 0x341   :  { %v1396_v59 = vrot.slane %v1391_v51, 4  ;;  %v1399_v61 = vsel %vm179_vm1, %v1391_v51, %v1398_v40  ;;  %v1409_v62 = vsel %vm179_vm1, %v1408_v52, %v1383_v36 }
 0x342   :  { %v1407_v10 = vperm.slane %v1399_v61, %v3886_v24  ;;  %v1415_v54 = vperm.slane %v1409_v62, %v3886_v24  ;;  %v1426_v39 = vrot.slane %v1419_v46, 4  ;;  %v1260_v21 = vpop.f32.mrf.mxu3  ;;  %v3538_v22 = vpop.eup %3537 }
 0x343   :  { %v1397_v0 = vsel %vm179_vm1, %v1396_v59, %v1379_v47  ;;  %v1368_v1 = vmul.f32 %v3536_v63, %v1260_v21  ;;  %v1349_v2 = vpop.xlane.xlu2 %1348  ;;  %v3540_v11 = vpop.eup %3539 }
 0x344   :  { %v1403_v3 = vperm.slane %v1397_v0, %v3886_v24  ;;  %v1422_v56 = vrot.slane %v1407_v10, 4  ;;  %v1424_v4 = vrot.slane %v1415_v54, 4  ;;  %v1427_v25 = vsel %vm179_vm1, 0.0, %v1426_v39  ;;  %v1306_v5 = vpop.f32.mrf.mxu1 }
 0x345   :  { %v1495_v6 = vsel %vm179_vm1, %v1426_v39, %v1415_v54  ;;  %v1500_v8 = vrot.slane %v1427_v25, 4  ;;  %v1430_v55 = vrot.slane %v1368_v1, 4  ;;  %3541 = vrcp.f32 %v1349_v2 }
 0x346   :  { %v1423_v33 = vsel %vm179_vm1, 0.0, %v1422_v56  ;;  %v1370_v58 = vmul.f32 %v3538_v22, %v1306_v5  ;;  %v1420_v9 = vrot.slane %v1403_v3, 4  ;;  %v1425_v12 = vsel %vm179_vm1, 0.0, %v1424_v4 }
 0x347   :  { %v1489_v16 = vrot.slane %v1423_v33, 4  ;;  %v1484_v17 = vsel %vm179_vm1, %v1422_v56, %v1403_v3  ;;  %v1499_v19 = vperm.slane %v1495_v6, %v3879_v15  ;;  %v1501_v20 = vsel %vm179_vm1, %v1500_v8, %v1425_v12 }
 0x348   :  { %v1428_v27 = vrot.slane %v1370_v58, 4  ;;  %v1421_v28 = vsel %vm179_vm1, 0.0, %v1420_v9  ;;  %v1488_v29 = vperm.slane %v1484_v17, %v3879_v15  ;;  %v1505_v50 = vperm.slane %v1501_v20, %v3879_v15 }
 0x349   :  { %v1490_v13 = vsel %vm179_vm1, %v1489_v16, %v1421_v28  ;;  %v1520_v60 = vrot.slane %v1499_v19, 4  ;;  %v1431_v31 = vsel %vm179_vm1, %v1370_v58, %v1430_v55 }
 0x34a   :  { %v1429_v30 = vsel %vm179_vm1, %v1428_v27, %v1368_v1  ;;  %v1494_v32 = vperm.slane %v1490_v13, %v3879_v15  ;;  %v1508_v34 = vrot.slane %v1488_v29, 4  ;;  %v1518_v26 = vrot.slane %v1505_v50, 4 }
 0x34b   :  { %v3542_v41 = vpop.eup %3541  ;;  %v1435_v7 = vperm.slane %v1429_v30, %v3879_v15  ;;  %v1329_v35 = vpop.f32.mrf.mxu2  ;;  %v1521_v43 = vsel %vm179_vm1, %v1505_v50, %v1520_v60  ;;  %v1439_v23 = vperm.slane %v1431_v31, %v3879_v15 }
 0x34c   :  { %v1371_v36 = vmul.f32 %v3540_v11, %v1329_v35  ;;  %v1283_v18 = vpop.f32.mrf.mxu0  ;;  %v1509_v42 = vsel %vm179_vm1, %v1494_v32, %v1508_v34  ;;  %v1529_v47 = vperm.slane %v1521_v43, %v3886_v24  ;;  %v1506_v44 = vrot.slane %v1494_v32, 4 }
 0x34d   :  { %v1369_v45 = vmul.f32 %v3542_v41, %v1283_v18  ;;  %v1517_v48 = vperm.slane %v1509_v42, %v3886_v24  ;;  %v1519_v37 = vsel %vm179_vm1, %v1518_v26, %v1499_v19  ;;  %v1454_v46 = vrot.slane %v1435_v7, 4 }
 0x34e   :  { %v1440_v14 = vrot.slane %v1371_v36, 4  ;;  %v1534_v38 = vrot.slane %v1529_v47, 4  ;;  %v1507_v40 = vsel %vm179_vm1, %v1506_v44, %v1488_v29  ;;  %v1525_v49 = vperm.slane %v1519_v37, %v3886_v24 }
 0x34f   :  { %v1442_v51 = vrot.slane %v1369_v45, 4  ;;  %v1536_v52 = vrot.slane %v1517_v48, 4  ;;  %v1513_v53 = vperm.slane %v1507_v40, %v3886_v24  ;;  %v1466_v39 = vrot.slane %v1439_v23, 4 }
 0x350   :  { %v1441_v57 = vsel %vm179_vm1, %v1440_v14, %v1369_v45  ;;  %v1535_v59 = vsel %vm179_vm1, %v1534_v38, %v1517_v48  ;;  %v1530_v61 = vrot.slane %v1525_v49, 4 }
 0x351   :  { %v1443_v62 = vsel %vm179_vm1, %v1371_v36, %v1442_v51  ;;  %v1447_v63 = vperm.slane %v1441_v57, %v3879_v15  ;;  %1602 = vrot.lane.b32.xlu1 %v1535_v59, %s3743_s19  ;;  %v1537_v10 = vsel %vm179_vm1, %v1529_v47, %v1536_v52  ;;  %v1532_v54 = vrot.slane %v1513_v53, 4  ;;  %v890_v52 = vld [vmem:[%s4904_s4 + $0x18] sm:$0xff]  ;;  %v887_v57 = vld [vmem:[%s4904_s4] sm:$0xff] }
 0x352   :  { %v1451_v21 = vperm.slane %v1443_v62, %v3879_v15  ;;  %1610 = vrot.lane.b32.xlu2 %v1537_v10, %s3744_s20  ;;  %v4313_v0 = vsel %vm179_vm1, %v1530_v61, %v1513_v53  ;;  %v889_v53 = vld [vmem:[%s4904_s4 + $0x10] sm:$0xff]  ;;  %1642 = vmatpush.msrb.mxu3 %v890_v52  ;;  %v1929_v59 = vld [vmem:[#allocation7 + $0x18] sm:$0xff]  ;;  %v1927_v62 = vld [vmem:[#allocation7 + $0x8] sm:$0xff] }
 0x353   :  { %v1452_v1 = vrot.slane %v1447_v63, 4  ;;  %v1455_v2 = vsel %vm179_vm1, %v1447_v63, %v1454_v46  ;;  %v1533_v3 = vsel %vm179_vm1, %v1525_v49, %v1532_v54  ;;  %v888_v46 = vld [vmem:[%s4904_s4 + $0x8] sm:$0xff]  ;;  %v1928_v61 = vld [vmem:[#allocation7 + $0x10] sm:$0xff]  ;;  %1948 = vmatpush.msrb.mxu1 %v1929_v59  ;;  %v1926_v63 = vld [vmem:[#allocation7] sm:$0xff] }
 0x354   :  { %v1463_v56 = vperm.slane %v1455_v2, %v3886_v24  ;;  %v1464_v4 = vrot.slane %v1451_v21, 4  ;;  %v1467_v25 = vsel %vm179_vm1, %v1451_v21, %v1466_v39  ;;  %1594 = vrot.lane.b32.xlu0 %v1533_v3, %s3731_s30  ;;  %1643 = vmatpush.msrb.mxu3 %v889_v53  ;;  %v122_v10 = vld [vmem:[#allocation5] sm:$0xff]  ;;  %v1656_v54 = vld [vmem:[%s4905_s5 + $0x18] sm:$0xff] }
 0x355   :  { %v1453_v5 = vsel %vm179_vm1, %v1452_v1, %v1435_v7  ;;  %v1475_v22 = vperm.slane %v1467_v25, %v3886_v24  ;;  %1949 = vmatpush.msrb.mxu1 %v1928_v61  ;;  %v1655_v39 = vld [vmem:[%s4905_s5 + $0x10] sm:$0xff]  ;;  %1675 = vmatpush.msra.mxu0 %v1656_v54 }
 0x356   :  { %v1459_v6 = vperm.slane %v1453_v5, %v3886_v24  ;;  %v1465_v8 = vsel %vm179_vm1, %v1464_v4, %v1439_v23  ;;  %v1478_v55 = vrot.slane %v1463_v56, 4  ;;  %1644 = vmatpush.msrb.mxu3 %v888_v46 }
 0x357   :  { %v1471_v33 = vperm.slane %v1465_v8, %v3886_v24  ;;  %v1482_v58 = vrot.slane %v1475_v22, 4  ;;  %1950 = vmatpush.msrb.mxu1 %v1927_v62  ;;  %1676 = vmatpush.msra.mxu0 %v1655_v39 }
 0x358   :  { %v1476_v9 = vrot.slane %v1459_v6, 4  ;;  %v1479_v12 = vsel %vm179_vm1, 0.0, %v1478_v55  ;;  %v1538_v16 = vsel %vm179_vm1, %v1478_v55, %v1459_v6  ;;  %1645 = vmatpush.msrb.mxu3 %v887_v57 }
 0x359   :  { %v1480_v17 = vrot.slane %v1471_v33, 4  ;;  %v1483_v19 = vsel %vm179_vm1, 0.0, %v1482_v58  ;;  %v1543_v20 = vrot.slane %v1479_v12, 4  ;;  %v1542_v27 = vperm.slane %v1538_v16, %v3879_v15  ;;  %1951 = vmatpush.msrb.mxu1 %v1926_v63  ;;  %v3575_v16 = vld [vmem:[#allocation2] sm:$0xff] }
 0x35a   :  { %v1554_v28 = vrot.slane %v1483_v19, 4  ;;  %v1477_v29 = vsel %vm179_vm1, 0.0, %v1476_v9  ;;  %v1549_v11 = vsel %vm179_vm1, %v1482_v58, %v1471_v33  ;;  %3416 = vmatmul.msk.f32.vlgmr.msrb.gmra.mxu1 %vm128_vm0, %v122_v10  ;;  %v1653_v33 = vld [vmem:[%s4905_s5] sm:$0xff]  ;;  %v123_v9 = vld [vmem:[#allocation5 + $0x8] sm:$0xff] }
 0x35b   :  { %v1481_v13 = vsel %vm179_vm1, 0.0, %v1480_v17  ;;  %v1544_v50 = vsel %vm179_vm1, %v1543_v20, %v1477_v29  ;;  %v1553_v60 = vperm.slane %v1549_v11, %v3879_v15  ;;  %v1562_v30 = vrot.slane %v1542_v27, 4  ;;  %v3576_v20 = vld [vmem:[#allocation2 + $0x8] sm:$0xff] }
 0x35c   :  { %v1548_v31 = vperm.slane %v1544_v50, %v3879_v15  ;;  %v1555_v32 = vsel %vm179_vm1, %v1554_v28, %v1481_v13 }
 0x35d   :  { %v1559_v34 = vperm.slane %v1555_v32, %v3879_v15  ;;  %v1574_v41 = vrot.slane %v1553_v60, 4 }
 0x35e   :  { %v1560_v7 = vrot.slane %v1548_v31, 4  ;;  %v1563_v35 = vsel %vm179_vm1, %v1548_v31, %v1562_v30 }
 0x35f   :  { %v1575_v43 = vsel %vm179_vm1, %v1559_v34, %v1574_v41  ;;  %v1572_v26 = vrot.slane %v1559_v34, 4  ;;  %v1571_v44 = vperm.slane %v1563_v35, %v3886_v24 }
 0x360   :  { %v1583_v36 = vperm.slane %v1575_v43, %v3886_v24  ;;  %v1561_v18 = vsel %vm179_vm1, %v1560_v7, %v1542_v27 }
 0x361   :  { %v1567_v42 = vperm.slane %v1561_v18, %v3886_v24  ;;  %v1573_v47 = vsel %vm179_vm1, %v1572_v26, %v1553_v60  ;;  %v1590_v49 = vrot.slane %v1571_v44, 4 }
 0x362   :  { %v1588_v23 = vrot.slane %v1583_v36, 4  ;;  %v1579_v45 = vperm.slane %v1573_v47, %v3886_v24  ;;  %3417 = vmatmul.msk.f32.gmra.mxu1 %vm128_vm0, %v123_v9 }
 0x363   :  { %v1586_v48 = vrot.slane %v1567_v42, 4  ;;  %v1591_v51 = vsel %vm179_vm1, %v1583_v36, %v1590_v49 }
 0x364   :  { %v1589_v37 = vsel %vm179_vm1, %v1588_v23, %v1571_v44  ;;  %v1584_v14 = vrot.slane %v1579_v45, 4 }
 0x365   :  { %1604 = vrot.lane.b32.xlu1 %v1589_v37, %s3743_s19  ;;  %v1587_v38 = vsel %vm179_vm1, %v1579_v45, %v1586_v48 }
 0x366   :  { %1596 = vrot.lane.b32.xlu0 %v1587_v38, %s3731_s30  ;;  %v1585_v40 = vsel %vm179_vm1, %v1584_v14, %v1567_v42 }
 0x36e   :  { %1612 = vrot.lane.b32.xlu0 %v1591_v51, %s3744_s20 }
 0x3ac   :  { %v1611_v3 = vpop.permute.xlu2 %1610 }
 0x3c3   :  { %v1603_v1 = vpop.permute.xlu1 %1602 }
 0x3c6   :  { %v1595_v21 = vpop.permute.xlu0 %1594 }
 0x3c7   :  { %v1616_v2 = vsel %vm891_vm2, %v4313_v0, %v1595_v21  ;;  %v1654_v0 = vld [vmem:[%s4905_s5 + $0x8] sm:$0xff] }
 0x3c8   :  { %v1619_v56 = vsel %vm1618_vm3, %v1616_v2, %v1603_v1  ;;  %1677 = vmatpush.msra.mxu0 %v1654_v0 }
 0x3c9   :  { %v1622_v4 = vsel %vm1621_vm4, %v1619_v56, %v1611_v3 }
 0x3ca   :  { %3412 = vmatmul.msk.f32.vlgmr.msrb.gmra.mxu3 %vm128_vm0, %v1622_v4  ;;  %1678 = vmatpush.msra.mxu0 %v1653_v33 }
 0x3d7   :  { %v1605_v5 = vpop.permute.xlu1 %1604  ;;  %v4386_v58 = vpop.f32.mrf.mxu1 }
 0x3d8   :  { %v1597_v25 = vpop.permute.xlu0 %1596  ;;  %1967 = vrot.lane.b32.xlu1 %v4386_v58, %s3737_s7  ;;  %1973 = vrot.lane.b32.xlu0 %v4386_v58, %s3736_s1  ;;  %v1981_v29 = vrot.slane %v4386_v58, 4 }
 0x3d9   :  { %v1617_v22 = vsel %vm891_vm2, %v1585_v40, %v1597_v25  ;;  %1961 = vrot.lane.b32.xlu2 %v4386_v58, %s3738_s3 }
 0x3da   :  { %v1620_v8 = vsel %vm1618_vm3, %v1617_v22, %v1605_v5 }
 0x3e0   :  { %v1613_v6 = vpop.permute.xlu0 %1612 }
 0x3e1   :  { %v1623_v55 = vsel %vm1621_vm4, %v1620_v8, %v1613_v6 }
 0x3e2   :  { %3413 = vmatmul.msk.f32.gmra.mxu3 %vm128_vm0, %v1623_v55 }
 0x433   :  { %v4403_v28 = vpop.permute.xlu2 %1961 }
 0x434   :  { %v1993_v11 = vrot.slane %v4403_v28, 4 }
 0x44a   :  { %v4407_v13 = vpop.permute.xlu1 %1967  ;;  %v4412_v30 = vpop.permute.xlu0 %1973 }
 0x44b   :  { %v1979_v50 = vrot.slane %v4407_v13, 4  ;;  %v1982_v60 = vsel %vm179_vm1, %v4407_v13, %v1981_v29  ;;  %v1991_v32 = vrot.slane %v4412_v30, 4  ;;  %v1994_v34 = vsel %vm179_vm1, %v4412_v30, %v1993_v11 }
 0x44c   :  { %v1990_v31 = vperm.slane %v1982_v60, %v3879_v15  ;;  %v2002_v7 = vperm.slane %v1994_v34, %v3879_v15  ;;  %v3745_v34 = vmov 0  }
 0x44d   :  { %v1647_v12 = vpop.f32.mrf.mxu3  ;;  %v1980_v41 = vsel %vm179_vm1, %v1979_v50, %v4386_v58  ;;  %v1992_v26 = vsel %vm179_vm1, %v1991_v32, %v4403_v28  ;;  %3487 = vset.pattern.permute.xlu1 %v3745_v34  ;;  %3486 = vset.pattern.permute.xlu2 %v3745_v34 }
 0x44e   :  { %v4395_v17 = vadd.f32 %v3575_v16, %v1647_v12  ;;  %v1986_v35 = vperm.slane %v1980_v41, %v3879_v15  ;;  %v2017_v43 = vrot.slane %v1990_v31, 4  ;;  %v1998_v36 = vperm.slane %v1992_v26, %v3879_v15  ;;  %3488 = vset.pattern.permute.xlu0 %v3745_v34 }
 0x44f   :  { %v2015_v18 = vrot.slane %v2002_v7, 4 }
 0x450   :  { %3414 = vmatmul.msk.f32.vlgmr.msra.gmra.mxu0 %vm128_vm0, %v4395_v17  ;;  %v2005_v42 = vrot.slane %v1986_v35, 4  ;;  %v2018_v47 = vsel %vm179_vm1, %v2002_v7, %v2017_v43  ;;  %v2003_v44 = vrot.slane %v1998_v36, 4  ;;  %v4464_v7 = vpop.f32.mrf.mxu1  ;;  %v2445_v43 = vld [vmem:[%s4902_s2] sm:$0xff] }
 0x451   :  { %v2016_v23 = vsel %vm179_vm1, %v2015_v18, %v1990_v31  ;;  %v2026_v45 = vperm.slane %v2018_v47, %v3886_v24  ;;  %v2446_v26 = vrot.slane %v2445_v43, 1  ;;  %v2451_v18 = vrot.slane %v2445_v43, 6 }
 0x452   :  { %v2006_v48 = vsel %vm179_vm1, %v1998_v36, %v2005_v42  ;;  %v2022_v37 = vperm.slane %v2016_v23, %v3886_v24  ;;  %v2004_v14 = vsel %vm179_vm1, %v2003_v44, %v1986_v35  ;;  %v2447_v36 = vrot.slane %v2445_v43, 2 }
 0x453   :  { %v2014_v38 = vperm.slane %v2006_v48, %v3886_v24  ;;  %v2033_v40 = vrot.slane %v2026_v45, 4  ;;  %v2010_v49 = vperm.slane %v2004_v14, %v3886_v24  ;;  %v2448_v42 = vrot.slane %v2445_v43, 3 }
 0x454   :  { %v2031_v51 = vrot.slane %v2022_v37, 4  ;;  %v2449_v47 = vrot.slane %v2445_v43, 4  ;;  %v2450_v44 = vrot.slane %v2445_v43, 5  ;;  %v3494_v23 = vpack.i.bf16 %v4412_v30, %v4407_v13 }
 0x455   :  { %v2029_v52 = vrot.slane %v2014_v38, 4  ;;  %v2034_v53 = vsel %vm179_vm1, 0.0, %v2033_v40  ;;  %v2027_v59 = vrot.slane %v2010_v49, 4  ;;  %v2102_v62 = vsel %vm179_vm1, %v2033_v40, %v2022_v37 }
 0x456   :  { %v2032_v46 = vsel %vm179_vm1, 0.0, %v2031_v51  ;;  %v2107_v57 = vrot.slane %v2034_v53, 4  ;;  %v2106_v54 = vperm.slane %v2102_v62, %v3879_v15  ;;  %v3489_v45 = vpack.i.bf16 %v4403_v28, %v4386_v58 }
 0x457   :  { %v2030_v61 = vsel %vm179_vm1, 0.0, %v2029_v52  ;;  %v2028_v21 = vsel %vm179_vm1, 0.0, %v2027_v59  ;;  %v2091_v1 = vsel %vm179_vm1, %v2029_v52, %v2010_v49  ;;  %v2452_v48 = vrot.slane %v2445_v43, 7 }
 0x458   :  { %v2108_v63 = vsel %vm179_vm1, %v2107_v57, %v2032_v46  ;;  %v2096_v10 = vrot.slane %v2030_v61, 4  ;;  %v2127_v56 = vrot.slane %v2106_v54, 4  ;;  %v2095_v4 = vperm.slane %v2091_v1, %v3879_v15 }
 0x459   :  { %v2112_v39 = vperm.slane %v2108_v63, %v3879_v15 }
 0x45a   :  { %v2097_v2 = vsel %vm179_vm1, %v2096_v10, %v2028_v21  ;;  %v2115_v55 = vrot.slane %v2095_v4, 4 }
 0x45b   :  { %v2125_v3 = vrot.slane %v2112_v39, 4  ;;  %v2101_v25 = vperm.slane %v2097_v2, %v3879_v15  ;;  %v2128_v22 = vsel %vm179_vm1, %v2112_v39, %v2127_v56 }
 0x45c   :  { %v2136_v0 = vperm.slane %v2128_v22, %v3886_v24 }
 0x45d   :  { %v2126_v5 = vsel %vm179_vm1, %v2125_v3, %v2106_v54  ;;  %v2113_v6 = vrot.slane %v2101_v25, 4  ;;  %v2116_v12 = vsel %vm179_vm1, %v2101_v25, %v2115_v55 }
 0x45e   :  { %v2132_v8 = vperm.slane %v2126_v5, %v3886_v24  ;;  %v2141_v16 = vrot.slane %v2136_v0, 4  ;;  %v2037_v5 = vrot.slane %v4464_v7, 4 }
 0x45f   :  { %v2114_v33 = vsel %vm179_vm1, %v2113_v6, %v2095_v4 }
 0x460   :  { %v2137_v9 = vrot.slane %v2132_v8, 4 }
 0x465   :  { %v1650_v19 = vpop.f32.mrf.mxu3 }
 0x466   :  { %v4399_v27 = vadd.f32 %v3576_v20, %v1650_v19  ;;  %v2120_v19 = vperm.slane %v2114_v33, %v3886_v24  ;;  %v2124_v20 = vperm.slane %v2116_v12, %v3886_v24 }
 0x468   :  { %3415 = vmatmul.msk.f32.gmra.mxu0 %vm128_vm0, %v4399_v27  ;;  %v2138_v29 = vsel %vm179_vm1, %v2137_v9, %v2120_v19  ;;  %v2139_v11 = vrot.slane %v2120_v19, 4  ;;  %v2142_v50 = vsel %vm179_vm1, %v2141_v16, %v2124_v20  ;;  %v2143_v60 = vrot.slane %v2124_v20, 4 }
 0x469   :  { %3418 = vmatpush.xpose.msk.msrb.mxu2 %vm891_vm2, %v2138_v29  ;;  %3422 = vmatpush.xpose.msk.msra.mxu3 %vm891_vm2, %v2142_v50 }
 0x46a   :  { %v2140_v31 = vsel %vm179_vm1, %v2132_v8, %v2139_v11  ;;  %v2144_v32 = vsel %vm179_vm1, %v2136_v0, %v2143_v60 }
 0x46b   :  { %3424 = vmatpush.xpose.msk.msrb.mxu0 %vm891_vm2, %v2144_v32 }
 0x46d   :  { %3420 = vmatpush.xpose.msk.msra.mxu2 %vm891_vm2, %v2140_v31 }
 0x4cd   :  { %v1680_v41 = vpop.f32.mrf.mxu0 }
 0x4ce   :  { %1700 = vrot.lane.b32.xlu0 %v1680_v41, %s3736_s1  ;;  %1694 = vrot.lane.b32.xlu1 %v1680_v41, %s3737_s7  ;;  %v1708_v49 = vrot.slane %v1680_v41, 4 }
 0x4cf   :  { %1688 = vrot.lane.b32.xlu2 %v1680_v41, %s3738_s3 }
 0x4d6   :  { %1975 = vrot.lane.b32.xlu0 %v4464_v7, %s3736_s1  ;;  %1969 = vrot.lane.b32.xlu1 %v4464_v7, %s3737_s7 }
 0x4d7   :  { %1963 = vrot.lane.b32.xlu2 %v4464_v7, %s3738_s3 }
 0x4e5   :  { %v4472_v35 = vpop.f32.mrf.mxu0 }
 0x4e6   :  { %1702 = vrot.lane.b32.xlu0 %v4472_v35, %s3736_s1  ;;  %1696 = vrot.lane.b32.xlu1 %v4472_v35, %s3737_s7 }
 0x4e7   :  { %1690 = vrot.lane.b32.xlu2 %v4472_v35, %s3738_s3 }
 0x4ee   :  { %2458 = vperm.xlu1 %3487, %v2446_v26   ;;  %2454 = vperm.xlu0 %3488, %v2445_v43  }
 0x4ef   :  { %2462 = vperm.xlu2 %3486, %v2447_v36  }
 0x4f6   :  { %2478 = vperm.xlu1 %3487, %v2451_v18   ;;  %2482 = vperm.xlu0 %3488, %v2452_v48  }
 0x4f7   :  { %2466 = vperm.xlu2 %3486, %v2448_v42  }
 0x4fe   :  { %2470 = vperm.xlu1 %3487, %v2449_v47  }
 0x4ff   :  { %2474 = vperm.xlu2 %3486, %v2450_v44  }
 0x506   :  { %3495 = vrot.lane.b32.xlu1 %v3494_v23, %s3739_s17 }
 0x507   :  { %3490 = vrot.lane.b32.xlu2 %v3489_v45, %s3739_s17 }
 0x529   :  { %v1689_v37 = vpop.permute.xlu2 %1688 }
 0x52a   :  { %v1720_v40 = vrot.slane %v1689_v37, 4 }
 0x531   :  { %v1964_v14 = vpop.permute.xlu2 %1963 }
 0x532   :  { %v3499_v38 = vpack.i.bf16 %v1964_v14, %v4464_v7  ;;  %v2049_v56 = vrot.slane %v1964_v14, 4 }
 0x534   :  { %3500 = vrot.lane.b32.xlu0 %v3499_v38, %s3739_s17 }
 0x540   :  { %v1695_v51 = vpop.permute.xlu1 %1694  ;;  %v1701_v52 = vpop.permute.xlu0 %1700 }
 0x541   :  { %v1706_v13 = vrot.slane %v1695_v51, 4  ;;  %v1709_v30 = vsel %vm179_vm1, %v1695_v51, %v1708_v49  ;;  %v1718_v58 = vrot.slane %v1701_v52, 4  ;;  %v1721_v28 = vsel %vm179_vm1, %v1701_v52, %v1720_v40  ;;  %v4508_v9 = vpop.permute.xlu2 %1690 }
 0x542   :  { %v1717_v53 = vperm.slane %v1709_v30, %v3879_v15  ;;  %v1729_v46 = vperm.slane %v1721_v28, %v3879_v15 }
 0x543   :  { %v1707_v57 = vsel %vm179_vm1, %v1706_v13, %v1680_v41  ;;  %v1719_v59 = vsel %vm179_vm1, %v1718_v58, %v1689_v37 }
 0x544   :  { %v1713_v61 = vperm.slane %v1707_v57, %v3879_v15  ;;  %v1744_v62 = vrot.slane %v1717_v53, 4  ;;  %v1725_v63 = vperm.slane %v1719_v59, %v3879_v15  ;;  %v1742_v10 = vrot.slane %v1729_v46, 4 }
 0x546   :  { %v1732_v54 = vrot.slane %v1713_v61, 4  ;;  %v1730_v39 = vrot.slane %v1725_v63, 4  ;;  %v1743_v21 = vsel %vm179_vm1, %v1742_v10, %v1717_v53  ;;  %v1745_v1 = vsel %vm179_vm1, %v1729_v46, %v1744_v62 }
 0x547   :  { %v1749_v2 = vperm.slane %v1743_v21, %v3886_v24  ;;  %v1753_v3 = vperm.slane %v1745_v1, %v3886_v24 }
 0x548   :  { %v1731_v4 = vsel %vm179_vm1, %v1730_v39, %v1713_v61  ;;  %v1733_v25 = vsel %vm179_vm1, %v1725_v63, %v1732_v54  ;;  %v1970_v22 = vpop.permute.xlu1 %1969  ;;  %v1976_v6 = vpop.permute.xlu0 %1975 }
 0x549   :  { %v1737_v8 = vperm.slane %v1731_v4, %v3886_v24  ;;  %v1741_v55 = vperm.slane %v1733_v25, %v3886_v24  ;;  %v1758_v0 = vrot.slane %v1749_v2, 4  ;;  %v1760_v33 = vrot.slane %v1753_v3, 4  ;;  %v4540_v54 = vpop.permute.xlu2 %2462 }
 0x54a   :  { %v2035_v12 = vrot.slane %v1970_v22, 4  ;;  %v2038_v16 = vsel %vm179_vm1, %v1970_v22, %v2037_v5  ;;  %v2047_v19 = vrot.slane %v1976_v6, 4  ;;  %v2050_v50 = vsel %vm179_vm1, %v1976_v6, %v2049_v56 }
 0x54b   :  { %v1754_v20 = vrot.slane %v1737_v8, 4  ;;  %v1756_v29 = vrot.slane %v1741_v55, 4  ;;  %v1761_v11 = vsel %vm179_vm1, 0.0, %v1760_v33  ;;  %v1829_v60 = vsel %vm179_vm1, %v1760_v33, %v1749_v2 }
 0x54c   :  { %v1834_v31 = vrot.slane %v1761_v11, 4  ;;  %v2036_v32 = vsel %vm179_vm1, %v2035_v12, %v4464_v7  ;;  %v2046_v34 = vperm.slane %v2038_v16, %v3879_v15  ;;  %v1759_v43 = vsel %vm179_vm1, 0.0, %v1758_v0 }
 0x54d   :  { %v1757_v41 = vsel %vm179_vm1, 0.0, %v1756_v29  ;;  %v1818_v26 = vsel %vm179_vm1, %v1756_v29, %v1737_v8  ;;  %v1833_v36 = vperm.slane %v1829_v60, %v3879_v15  ;;  %v2042_v47 = vperm.slane %v2036_v32, %v3879_v15 }
 0x54e   :  { %v1823_v18 = vrot.slane %v1757_v41, 4  ;;  %v1835_v42 = vsel %vm179_vm1, %v1834_v31, %v1759_v43  ;;  %v2073_v44 = vrot.slane %v2046_v34, 4  ;;  %v1755_v23 = vsel %vm179_vm1, 0.0, %v1754_v20 }
 0x54f   :  { %v1839_v7 = vperm.slane %v1835_v42, %v3879_v15  ;;  %v2048_v45 = vsel %vm179_vm1, %v2047_v19, %v1964_v14  ;;  %v2058_v48 = vperm.slane %v2050_v50, %v3879_v15  ;;  %v1854_v37 = vrot.slane %v1833_v36, 4 }
 0x550   :  { %v2061_v38 = vrot.slane %v2042_v47, 4  ;;  %v2054_v40 = vperm.slane %v2048_v45, %v3879_v15  ;;  %v3504_v49 = vpack.i.bf16 %v1976_v6, %v1970_v22  ;;  %v1822_v13 = vperm.slane %v1818_v26, %v3879_v15 }
 0x551   :  { %v2071_v51 = vrot.slane %v2058_v48, 4  ;;  %v2074_v52 = vsel %vm179_vm1, %v2058_v48, %v2073_v44  ;;  %v1824_v30 = vsel %vm179_vm1, %v1823_v18, %v1755_v23  ;;  %v1764_v14 = vrot.slane %v4472_v35, 4 }
 0x552   :  { %v2059_v58 = vrot.slane %v2054_v40, 4  ;;  %v2062_v28 = vsel %vm179_vm1, %v2054_v40, %v2061_v38  ;;  %v2082_v53 = vperm.slane %v2074_v52, %v3886_v24  ;;  %3505 = vrot.lane.b32.xlu2 %v3504_v49, %s3739_s17  ;;  %v1828_v59 = vperm.slane %v1824_v30, %v3879_v15  ;;  %v4573_v38 = vpop.permute.xlu2 %2466 }
 0x553   :  { %v2070_v46 = vperm.slane %v2062_v28, %v3886_v24  ;;  %v2072_v57 = vsel %vm179_vm1, %v2071_v51, %v2046_v34  ;;  %v1842_v61 = vrot.slane %v1822_v13, 4  ;;  %v1855_v39 = vsel %vm179_vm1, %v1839_v7, %v1854_v37 }
 0x554   :  { %v2060_v62 = vsel %vm179_vm1, %v2059_v58, %v2042_v47  ;;  %v2078_v63 = vperm.slane %v2072_v57, %v3886_v24  ;;  %v2089_v10 = vrot.slane %v2082_v53, 4  ;;  %v1863_v3 = vperm.slane %v1855_v39, %v3886_v24 }
 0x555   :  { %v2066_v21 = vperm.slane %v2060_v62, %v3886_v24  ;;  %v2085_v1 = vrot.slane %v2070_v46, 4  ;;  %v1843_v2 = vsel %vm179_vm1, %v1828_v59, %v1842_v61  ;;  %v1776_v22 = vrot.slane %v4508_v9, 4 }
 0x556   :  { %v2087_v56 = vrot.slane %v2078_v63, 4  ;;  %v2090_v4 = vsel %vm179_vm1, 0.0, %v2089_v10  ;;  %v2156_v25 = vsel %vm179_vm1, %v2089_v10, %v2078_v63  ;;  %v1851_v5 = vperm.slane %v1843_v2, %v3886_v24 }
 0x557   :  { %v2083_v6 = vrot.slane %v2066_v21, 4  ;;  %v2086_v8 = vsel %vm179_vm1, 0.0, %v2085_v1  ;;  %v2161_v55 = vrot.slane %v2090_v4, 4  ;;  %v4553_v33 = vperm.slane %v2156_v25, %v3879_v15 }
 0x558   :  { %v2088_v0 = vsel %vm179_vm1, 0.0, %v2087_v56  ;;  %v1868_v12 = vrot.slane %v1863_v3, 4  ;;  %v1840_v16 = vrot.slane %v1828_v59, 4  ;;  %v1697_v19 = vpop.permute.xlu1 %1696  ;;  %v2150_v20 = vrot.slane %v2086_v8, 4  ;;  %v1703_v60 = vpop.permute.xlu0 %1702 }
 0x559   :  { %v1852_v29 = vrot.slane %v1839_v7, 4  ;;  %v1870_v11 = vrot.slane %v1851_v5, 4  ;;  %v1762_v50 = vrot.slane %v1697_v19, 4  ;;  %v2162_v31 = vsel %vm179_vm1, %v2161_v55, %v2088_v0 }
 0x55a   :  { %v1869_v32 = vsel %vm179_vm1, %v1868_v12, %v1851_v5  ;;  %v1841_v34 = vsel %vm179_vm1, %v1840_v16, %v1822_v13  ;;  %v1765_v41 = vsel %vm179_vm1, %v1697_v19, %v1764_v14  ;;  %v1774_v7 = vrot.slane %v1703_v60, 4 }
 0x55b   :  { %3423 = vmatmul.msk.f32.vlgmr.msra.gmra.mxu3 %vm891_vm2, %v1869_v32  ;;  %v1847_v43 = vperm.slane %v1841_v34, %v3886_v24  ;;  %v1853_v26 = vsel %vm179_vm1, %v1852_v29, %v1833_v36  ;;  %v1871_v18 = vsel %vm179_vm1, %v1863_v3, %v1870_v11  ;;  %v1763_v42 = vsel %vm179_vm1, %v1762_v50, %v4472_v35  ;;  %v4602_v50 = vpop.permute.xlu2 %2474 }
 0x55c   :  { %v1859_v47 = vperm.slane %v1853_v26, %v3886_v24  ;;  %3425 = vmatmul.msk.f32.vlgmr.msrb.gmra.mxu0 %vm891_vm2, %v1871_v18  ;;  %v1769_v44 = vperm.slane %v1763_v42, %v3879_v15  ;;  %v1773_v23 = vperm.slane %v1765_v41, %v3879_v15  ;;  %v1777_v45 = vsel %vm179_vm1, %v1703_v60, %v1776_v22 }
 0x55d   :  { %v2084_v48 = vsel %vm179_vm1, 0.0, %v2083_v6  ;;  %v2145_v36 = vsel %vm179_vm1, %v2085_v1, %v2066_v21  ;;  %v2166_v37 = vperm.slane %v2162_v31, %v3879_v15  ;;  %v1775_v51 = vsel %vm179_vm1, %v1774_v7, %v4508_v9 }
 0x55e   :  { %v1864_v35 = vrot.slane %v1859_v47, 4  ;;  %v1788_v40 = vrot.slane %v1769_v44, 4  ;;  %v1800_v49 = vrot.slane %v1773_v23, 4  ;;  %v1781_v52 = vperm.slane %v1775_v51, %v3879_v15 }
 0x55f   :  { %v1785_v13 = vperm.slane %v1777_v45, %v3879_v15  ;;  %v2149_v30 = vperm.slane %v2145_v36, %v3879_v15  ;;  %v2151_v58 = vsel %vm179_vm1, %v2150_v20, %v2084_v48  ;;  %v2181_v14 = vrot.slane %v4553_v33, 4 }
 0x560   :  { %v1865_v28 = vsel %vm179_vm1, %v1864_v35, %v1847_v43  ;;  %v2155_v53 = vperm.slane %v2151_v58, %v3879_v15  ;;  %v4584_v46 = vpop.permute.xlu1 %2458  ;;  %v1786_v57 = vrot.slane %v1781_v52, 4  ;;  %v1789_v9 = vsel %vm179_vm1, %v1781_v52, %v1788_v40 }
 0x561   :  { %3419 = vmatmul.msk.f32.vlgmr.msrb.gmra.mxu2 %vm891_vm2, %v1865_v28  ;;  %v1798_v59 = vrot.slane %v1785_v13, 4  ;;  %v1801_v61 = vsel %vm179_vm1, %v1785_v13, %v1800_v49  ;;  %v1797_v62 = vperm.slane %v1789_v9, %v3886_v24  ;;  %v2169_v10 = vrot.slane %v2149_v30, 4 }
 0x562   :  { %v1809_v63 = vperm.slane %v1801_v61, %v3886_v24  ;;  %v2182_v39 = vsel %vm179_vm1, %v2166_v37, %v2181_v14  ;;  %v1787_v21 = vsel %vm179_vm1, %v1786_v57, %v1769_v44  ;;  %v1866_v3 = vrot.slane %v1847_v43, 4 }
 0x563   :  { %v1799_v1 = vsel %vm179_vm1, %v1798_v59, %v1773_v23  ;;  %v2190_v2 = vperm.slane %v2182_v39, %v3886_v24  ;;  %v1793_v56 = vperm.slane %v1787_v21, %v3886_v24  ;;  %v1812_v25 = vrot.slane %v1797_v62, 4 }
 0x564   :  { %v1805_v4 = vperm.slane %v1799_v1, %v3886_v24  ;;  %v1816_v5 = vrot.slane %v1809_v63, 4  ;;  %v2170_v22 = vsel %vm179_vm1, %v2155_v53, %v2169_v10  ;;  %v2167_v6 = vrot.slane %v2155_v53, 4  ;;  %v3491_v63 = vpop.permute.xlu2 %3490 }
 0x565   :  { %v2179_v8 = vrot.slane %v2166_v37, 4  ;;  %v1813_v55 = vsel %vm179_vm1, 0.0, %v1812_v25  ;;  %v2195_v16 = vrot.slane %v2190_v2, 4  ;;  %v1810_v19 = vrot.slane %v1793_v56, 4 }
 0x566   :  { %v1814_v0 = vrot.slane %v1805_v4, 4  ;;  %v1817_v12 = vsel %vm179_vm1, 0.0, %v1816_v5  ;;  %v1883_v20 = vsel %vm179_vm1, %v1816_v5, %v1805_v4  ;;  %v1867_v11 = vsel %vm179_vm1, %v1859_v47, %v1866_v3 }
 0x567   :  { %v1888_v29 = vrot.slane %v1817_v12, 4  ;;  %v1877_v31 = vrot.slane %v1813_v55, 4  ;;  %v1887_v32 = vperm.slane %v1883_v20, %v3879_v15  ;;  %v2178_v34 = vperm.slane %v2170_v22, %v3886_v24 }
 0x568   :  { %v1815_v60 = vsel %vm179_vm1, 0.0, %v1814_v0  ;;  %v4607_v41 = vpop.permute.xlu1 %2478  ;;  %v1872_v43 = vsel %vm179_vm1, %v1812_v25, %v1793_v56  ;;  %v2168_v18 = vsel %vm179_vm1, %v2167_v6, %v2149_v30  ;;  %v2180_v42 = vsel %vm179_vm1, %v2179_v8, %v4553_v33 }
 0x569   :  { %v1889_v26 = vsel %vm179_vm1, %v1888_v29, %v1815_v60  ;;  %3421 = vmatmul.msk.f32.vlgmr.msra.gmra.mxu2 %vm891_vm2, %v1867_v11  ;;  %v1908_v44 = vrot.slane %v1887_v32, 4  ;;  %v2196_v23 = vsel %vm179_vm1, %v2195_v16, %v2178_v34  ;;  %v2174_v7 = vperm.slane %v2168_v18, %v3886_v24 }
 0x56a   :  { %v1893_v47 = vperm.slane %v1889_v26, %v3879_v15  ;;  %v1811_v45 = vsel %vm179_vm1, 0.0, %v1810_v19  ;;  %3430 = vmatpush.xpose.msk.msrb.mxu3 %vm891_vm2, %v2196_v23  ;;  %v2186_v48 = vperm.slane %v2180_v42, %v3886_v24  ;;  %v2197_v36 = vrot.slane %v2178_v34, 4 }
 0x56b   :  { %v2193_v37 = vrot.slane %v2174_v7, 4  ;;  %v1876_v35 = vperm.slane %v1872_v43, %v3879_v15  ;;  %v1878_v40 = vsel %vm179_vm1, %v1877_v31, %v1811_v45  ;;  %v3493_v56 = vunpack.i.h.bf16 %v3491_v63 }
 0x56c   :  { %v2191_v33 = vrot.slane %v2186_v48, 4  ;;  %v2198_v49 = vsel %vm179_vm1, %v2190_v2, %v2197_v36  ;;  %v1882_v52 = vperm.slane %v1878_v40, %v3879_v15  ;;  %v1909_v30 = vsel %vm179_vm1, %v1893_v47, %v1908_v44 }
 0x56d   :  { %3432 = vmatpush.xpose.msk.msra.mxu0 %vm891_vm2, %v2198_v49  ;;  %v2194_v51 = vsel %vm179_vm1, %v2186_v48, %v2193_v37  ;;  %v1896_v13 = vrot.slane %v1876_v35, 4  ;;  %v1917_v28 = vperm.slane %v1909_v30, %v3886_v24  ;;  %v1906_v53 = vrot.slane %v1893_v47, 4 }
 0x56e   :  { %v2192_v58 = vsel %vm179_vm1, %v2191_v33, %v2174_v7  ;;  %3428 = vmatpush.xpose.msk.msrb.mxu2 %vm891_vm2, %v2194_v51  ;;  %v1894_v9 = vrot.slane %v1882_v52, 4  ;;  %v3492_v4 = vunpack.i.l.bf16 %v3491_v63  ;;  %v2237_v55 = vrot.slane %v3493_v56, 4 }
 0x56f   :  { %3426 = vmatpush.xpose.msk.msra.mxu1 %vm891_vm2, %v2192_v58  ;;  %v1897_v14 = vsel %vm179_vm1, %v1882_v52, %v1896_v13  ;;  %v1922_v61 = vrot.slane %v1917_v28, 4  ;;  %v1907_v62 = vsel %vm179_vm1, %v1906_v53, %v1887_v32 }
 0x570   :  { %v4633_v57 = vpop.permute.xlu1 %2470  ;;  %v1905_v59 = vperm.slane %v1897_v14, %v3886_v24  ;;  %v1895_v10 = vsel %vm179_vm1, %v1894_v9, %v1876_v35  ;;  %v1913_v39 = vperm.slane %v1907_v62, %v3886_v24  ;;  %v2225_v0 = vrot.slane %v3492_v4, 4 }
 0x571   :  { %v1901_v1 = vperm.slane %v1895_v10, %v3886_v24 }
 0x572   :  { %v1923_v21 = vsel %vm179_vm1, %v1922_v61, %v1905_v59  ;;  %v1924_v2 = vrot.slane %v1905_v59, 4  ;;  %v1918_v3 = vrot.slane %v1913_v39, 4 }
 0x573   :  { %3431 = vmatmul.msk.f32.vlgmr.msrb.gmra.mxu3 %vm891_vm2, %v1923_v21  ;;  %v1920_v5 = vrot.slane %v1901_v1, 4 }
 0x574   :  { %v1925_v25 = vsel %vm179_vm1, %v1917_v28, %v1924_v2  ;;  %v1919_v22 = vsel %vm179_vm1, %v1918_v3, %v1901_v1 }
 0x575   :  { %3433 = vmatmul.msk.f32.vlgmr.msra.gmra.mxu0 %vm891_vm2, %v1925_v25  ;;  %3427 = vmatmul.msk.f32.vlgmr.msra.gmra.mxu1 %vm891_vm2, %v1919_v22  ;;  %v1921_v6 = vsel %vm179_vm1, %v1913_v39, %v1920_v5 }
 0x576   :  { %3429 = vmatmul.msk.f32.vlgmr.msrb.gmra.mxu2 %vm891_vm2, %v1921_v6 }
 0x578   :  { %v3496_v8 = vpop.permute.xlu1 %3495 }
 0x579   :  { %v3498_v12 = vunpack.i.h.bf16 %v3496_v8  ;;  %v3497_v16 = vunpack.i.l.bf16 %v3496_v8 }
 0x57b   :  { %v2235_v19 = vrot.slane %v3498_v12, 4  ;;  %v2238_v20 = vsel %vm179_vm1, %v3498_v12, %v2237_v55  ;;  %v2223_v29 = vrot.slane %v3497_v16, 4  ;;  %v2226_v11 = vsel %vm179_vm1, %v3497_v16, %v2225_v0 }
 0x57c   :  { %v2246_v60 = vperm.slane %v2238_v20, %v3879_v15  ;;  %v2234_v31 = vperm.slane %v2226_v11, %v3879_v15 }
 0x57d   :  { %v2236_v32 = vsel %vm179_vm1, %v2235_v19, %v3493_v56  ;;  %v2224_v34 = vsel %vm179_vm1, %v2223_v29, %v3492_v4 }
 0x57e   :  { %v2242_v43 = vperm.slane %v2236_v32, %v3879_v15  ;;  %v2259_v26 = vrot.slane %v2246_v60, 4  ;;  %v2230_v18 = vperm.slane %v2224_v34, %v3879_v15  ;;  %v2261_v42 = vrot.slane %v2234_v31, 4 }
 0x580   :  { %v2247_v47 = vrot.slane %v2242_v43, 4  ;;  %v2249_v44 = vrot.slane %v2230_v18, 4  ;;  %v2260_v23 = vsel %vm179_vm1, %v2259_v26, %v2234_v31  ;;  %v2262_v7 = vsel %vm179_vm1, %v2246_v60, %v2261_v42  ;;  %v4687_v60 = vpop.permute.xlu0 %2454 }
 0x581   :  { %v2266_v45 = vperm.slane %v2260_v23, %v3886_v24  ;;  %v2270_v48 = vperm.slane %v2262_v7, %v3886_v24 }
 0x582   :  { %v2248_v36 = vsel %vm179_vm1, %v2247_v47, %v2230_v18  ;;  %v2250_v37 = vsel %vm179_vm1, %v2242_v43, %v2249_v44 }
 0x583   :  { %v2254_v35 = vperm.slane %v2248_v36, %v3886_v24  ;;  %v2258_v40 = vperm.slane %v2250_v37, %v3886_v24  ;;  %v2275_v33 = vrot.slane %v2266_v45, 4  ;;  %v2277_v49 = vrot.slane %v2270_v48, 4 }
 0x585   :  { %v2271_v51 = vrot.slane %v2254_v35, 4  ;;  %v2273_v52 = vrot.slane %v2258_v40, 4  ;;  %v2278_v13 = vsel %vm179_vm1, 0.0, %v2277_v49  ;;  %v2346_v30 = vsel %vm179_vm1, %v2277_v49, %v2266_v45 }
 0x586   :  { %v2351_v58 = vrot.slane %v2278_v13, 4  ;;  %v2276_v53 = vsel %vm179_vm1, 0.0, %v2275_v33  ;;  %v2350_v9 = vperm.slane %v2346_v30, %v3879_v15 }
 0x587   :  { %v2274_v28 = vsel %vm179_vm1, 0.0, %v2273_v52  ;;  %v2335_v14 = vsel %vm179_vm1, %v2273_v52, %v2254_v35  ;;  %v2272_v63 = vsel %vm179_vm1, 0.0, %v2271_v51 }
 0x588   :  { %v2340_v59 = vrot.slane %v2274_v28, 4  ;;  %v2339_v61 = vperm.slane %v2335_v14, %v3879_v15  ;;  %v2352_v62 = vsel %vm179_vm1, %v2351_v58, %v2276_v53  ;;  %v2371_v39 = vrot.slane %v2350_v9, 4  ;;  %v4690_v34 = vpop.permute.xlu0 %2482 }
 0x589   :  { %v2356_v10 = vperm.slane %v2352_v62, %v3879_v15 }
 0x58a   :  { %v2341_v21 = vsel %vm179_vm1, %v2340_v59, %v2272_v63  ;;  %v2359_v1 = vrot.slane %v2339_v61, 4 }
 0x58b   :  { %v2345_v2 = vperm.slane %v2341_v21, %v3879_v15  ;;  %v2372_v3 = vsel %vm179_vm1, %v2356_v10, %v2371_v39  ;;  %v2369_v56 = vrot.slane %v2356_v10, 4 }
 0x58c   :  { %v2380_v4 = vperm.slane %v2372_v3, %v3886_v24 }
 0x58d   :  { %v2360_v25 = vsel %vm179_vm1, %v2345_v2, %v2359_v1  ;;  %v2357_v5 = vrot.slane %v2345_v2, 4  ;;  %v2370_v22 = vsel %vm179_vm1, %v2369_v56, %v2350_v9 }
 0x58e   :  { %v2368_v6 = vperm.slane %v2360_v25, %v3886_v24  ;;  %v2385_v8 = vrot.slane %v2380_v4, 4  ;;  %v2376_v55 = vperm.slane %v2370_v22, %v3886_v24 }
 0x58f   :  { %v2358_v0 = vsel %vm179_vm1, %v2357_v5, %v2339_v61 }
 0x590   :  { %v2386_v12 = vsel %vm179_vm1, %v2385_v8, %v2368_v6  ;;  %v2364_v16 = vperm.slane %v2358_v0, %v3886_v24  ;;  %v2381_v19 = vrot.slane %v2376_v55, 4  ;;  %v2387_v20 = vrot.slane %v2368_v6, 4 }
 0x591   :  { %2841 = vmatpush.msra.mxu3 %v2386_v12 }
 0x592   :  { %v2382_v29 = vsel %vm179_vm1, %v2381_v19, %v2364_v16  ;;  %v2388_v11 = vsel %vm179_vm1, %v2380_v4, %v2387_v20  ;;  %v2383_v31 = vrot.slane %v2364_v16, 4 }
 0x593   :  { %2795 = vmatpush.msrb.mxu1 %v2382_v29  ;;  %2864 = vmatpush.msrb.mxu0 %v2388_v11 }
 0x594   :  { %v2384_v32 = vsel %vm179_vm1, %v2376_v55, %v2383_v31 }
 0x595   :  { %2818 = vmatpush.msra.mxu2 %v2384_v32 }
 0x5a6   :  { %v3501_v43 = vpop.permute.xlu0 %3500 }
 0x5a7   :  { %v3503_v26 = vunpack.i.h.bf16 %v3501_v43  ;;  %v3502_v18 = vunpack.i.l.bf16 %v3501_v43 }
 0x5a9   :  { %v2293_v42 = vrot.slane %v3503_v26, 4  ;;  %v2281_v47 = vrot.slane %v3502_v18, 4 }
 0x5ac   :  { %v3506_v44 = vpop.permute.xlu2 %3505 }
 0x5ad   :  { %v3508_v23 = vunpack.i.h.bf16 %v3506_v44  ;;  %v3507_v7 = vunpack.i.l.bf16 %v3506_v44 }
 0x5af   :  { %v2291_v45 = vrot.slane %v3508_v23, 4  ;;  %v2279_v48 = vrot.slane %v3507_v7, 4  ;;  %v2294_v36 = vsel %vm179_vm1, %v3508_v23, %v2293_v42  ;;  %v2282_v37 = vsel %vm179_vm1, %v3507_v7, %v2281_v47 }
 0x5b0   :  { %v2302_v35 = vperm.slane %v2294_v36, %v3879_v15  ;;  %v2290_v40 = vperm.slane %v2282_v37, %v3879_v15 }
 0x5b1   :  { %v2292_v33 = vsel %vm179_vm1, %v2291_v45, %v3503_v26  ;;  %v2280_v49 = vsel %vm179_vm1, %v2279_v48, %v3502_v18 }
 0x5b2   :  { %v2298_v51 = vperm.slane %v2292_v33, %v3879_v15  ;;  %v2315_v52 = vrot.slane %v2302_v35, 4  ;;  %v2286_v13 = vperm.slane %v2280_v49, %v3879_v15  ;;  %v2317_v30 = vrot.slane %v2290_v40, 4 }
 0x5b4   :  { %v2303_v58 = vrot.slane %v2298_v51, 4  ;;  %v2305_v28 = vrot.slane %v2286_v13, 4  ;;  %v2316_v53 = vsel %vm179_vm1, %v2315_v52, %v2290_v40  ;;  %v2318_v14 = vsel %vm179_vm1, %v2302_v35, %v2317_v30 }
 0x5b5   :  { %v2322_v9 = vperm.slane %v2316_v53, %v3886_v24  ;;  %v2326_v59 = vperm.slane %v2318_v14, %v3886_v24  ;;  %v2464_v52 = vperm.slane %v4540_v54, 0  ;;  %v2468_v30 = vperm.slane %v4573_v38, 0 }
 0x5b6   :  { %v2304_v61 = vsel %vm179_vm1, %v2303_v58, %v2286_v13  ;;  %v2306_v62 = vsel %vm179_vm1, %v2298_v51, %v2305_v28  ;;  %v2443_v51 = vlaneseq  ;;  %v2456_v58 = vperm.slane %v4687_v60, 0 }
 0x5b7   :  { %v2310_v63 = vperm.slane %v2304_v61, %v3886_v24  ;;  %v2314_v10 = vperm.slane %v2306_v62, %v3886_v24  ;;  %v2331_v39 = vrot.slane %v2322_v9, 4  ;;  %v2333_v21 = vrot.slane %v2326_v59, 4 }
 0x5b8   :  { %v2444_v13 = vand.u32 127, %v2443_v51 }
 0x5b9   :  { %v2327_v1 = vrot.slane %v2310_v63, 4  ;;  %v2329_v2 = vrot.slane %v2314_v10, 4  ;;  %v2334_v3 = vsel %vm179_vm1, 0.0, %v2333_v21  ;;  %v2400_v4 = vsel %vm179_vm1, %v2333_v21, %v2322_v9 }
 0x5ba   :  { %v2405_v56 = vrot.slane %v2334_v3, 4  ;;  %v2332_v5 = vsel %vm179_vm1, 0.0, %v2331_v39  ;;  %v2404_v6 = vperm.slane %v2400_v4, %v3879_v15  ;;  %vm2487_vm5 = vcmp.ge.s32.totalorder %v2444_v13, %v2464_v52 }
 0x5bb   :  { %v2330_v25 = vsel %vm179_vm1, 0.0, %v2329_v2  ;;  %v2389_v22 = vsel %vm179_vm1, %v2329_v2, %v2310_v63  ;;  %v2328_v12 = vsel %vm179_vm1, 0.0, %v2327_v1  ;;  %vm2488_vm6 = vcmp.ge.s32.totalorder %v2444_v13, %v2468_v30 }
 0x5bc   :  { %v2394_v8 = vrot.slane %v2330_v25, 4  ;;  %v2393_v55 = vperm.slane %v2389_v22, %v3879_v15  ;;  %v2406_v0 = vsel %vm179_vm1, %v2405_v56, %v2332_v5  ;;  %v2425_v19 = vrot.slane %v2404_v6, 4 }
 0x5bd   :  { %v2410_v16 = vperm.slane %v2406_v0, %v3879_v15  ;;  %vm2485_vm7 = vcmp.ge.s32.totalorder %v2444_v13, %v2456_v58  ;;  %v2460_v63 = vperm.slane %v4584_v46, 0  ;;  %v2472_v21 = vperm.slane %v4633_v57, 0 }
 0x5be   :  { %v2395_v20 = vsel %vm179_vm1, %v2394_v8, %v2328_v12  ;;  %v2413_v29 = vrot.slane %v2393_v55, 4  ;;  %v2480_v1 = vperm.slane %v4607_v41, 0  ;;  %v2476_v56 = vperm.slane %v4602_v50, 0 }
 0x5bf   :  { %v2399_v11 = vperm.slane %v2395_v20, %v3879_v15  ;;  %v2426_v31 = vsel %vm179_vm1, %v2410_v16, %v2425_v19  ;;  %v2423_v32 = vrot.slane %v2410_v16, 4  ;;  %vm2486_vm8 = vcmp.ge.s32.totalorder %v2444_v13, %v2460_v63 }
 0x5c0   :  { %v2434_v43 = vperm.slane %v2426_v31, %v3886_v24  ;;  %vm2489_vm9 = vcmp.ge.s32.totalorder %v2444_v13, %v2472_v21  ;;  %v2484_v4 = vperm.slane %v4690_v34, 0  ;;  %vm2491_vm10 = vcmp.ge.s32.totalorder %v2444_v13, %v2480_v1 }
 0x5c1   :  { %v2414_v26 = vsel %vm179_vm1, %v2399_v11, %v2413_v29  ;;  %v2411_v18 = vrot.slane %v2399_v11, 4  ;;  %v2424_v42 = vsel %vm179_vm1, %v2423_v32, %v2404_v6  ;;  %vm2490_vm12 = vcmp.ge.s32.totalorder %v2444_v13, %v2476_v56 }
 0x5c2   :  { %v2422_v47 = vperm.slane %v2414_v26, %v3886_v24  ;;  %v2439_v44 = vrot.slane %v2434_v43, 4  ;;  %v2430_v23 = vperm.slane %v2424_v42, %v3886_v24  ;;  %vm2492_vm11 = vcmp.ge.s32.totalorder %v2444_v13, %v2484_v4 }
 0x5c3   :  { %v2412_v7 = vsel %vm179_vm1, %v2411_v18, %v2393_v55 }
 0x5c4   :  { %v2440_v45 = vsel %vm179_vm1, %v2439_v44, %v2422_v47  ;;  %v2441_v48 = vrot.slane %v2422_v47, 4  ;;  %v2418_v36 = vperm.slane %v2412_v7, %v3886_v24  ;;  %v2435_v37 = vrot.slane %v2430_v23, 4 }
 0x5c5   :  { %2933 = vmatpush.msrb.mxu3 %v2440_v45 }
 0x5c6   :  { %v2442_v35 = vsel %vm179_vm1, %v2434_v43, %v2441_v48  ;;  %v2436_v40 = vsel %vm179_vm1, %v2435_v37, %v2418_v36  ;;  %v2437_v33 = vrot.slane %v2418_v36, 4 }
 0x5c7   :  { %2956 = vmatpush.msra.mxu0 %v2442_v35  ;;  %2887 = vmatpush.msra.mxu1 %v2436_v40 }
 0x5c8   :  { %v2438_v49 = vsel %vm179_vm1, %v2430_v23, %v2437_v33 }
 0x5c9   :  { %2910 = vmatpush.msrb.mxu2 %v2438_v49 }
 0x5d9   :  { %v2598_v9 = vpop.f32.mrf.mxu0 }
 0x5da   :  { %v2724_v61 = vsel %vm2488_vm6, -1000000.0, %v2598_v9 }
 0x5db   :  { %v2738_v38 = vsel %vm891_vm2, %v2724_v61, -inf }
 0x5de   :  { %v2572_v28 = vpop.f32.mrf.mxu3 }
 0x5df   :  { %v2723_v53 = vsel %vm2487_vm5, -1000000.0, %v2572_v28 }
 0x5e0   :  { %v2735_v14 = vsel %vm891_vm2, %v2723_v53, -inf }
 0x5e1   :  { %2736 = vmax.xlane.f32.xlu1 %v2735_v14 }
 0x5e4   :  { %v2520_v59 = vpop.f32.mrf.mxu2 }
 0x5e5   :  { %v2721_v62 = vsel %vm2485_vm7, -1000000.0, %v2520_v59 }
 0x5e6   :  { %v2729_v54 = vsel %vm891_vm2, %v2721_v62, -inf }
 0x5e7   :  { %2730 = vmax.xlane.f32.xlu2 %v2729_v54 }
 0x5e9   :  { %2739 = vmax.xlane.f32.xlu1 %v2738_v38 }
 0x5ec   :  { %v2546_v60 = vpop.f32.mrf.mxu2 }
 0x5ed   :  { %v2722_v10 = vsel %vm2486_vm8, -1000000.0, %v2546_v60 }
 0x5ee   :  { %v2732_v39 = vsel %vm891_vm2, %v2722_v10, -inf }
 0x5ef   :  { %2733 = vmax.xlane.f32.xlu0 %v2732_v39 }
 0x5f2   :  { %v2624_v2 = vpop.f32.mrf.mxu1  ;;  %v2702_v57 = vpop.f32.mrf.mxu0 }
 0x5f3   :  { %v2725_v3 = vsel %vm2489_vm9, -1000000.0, %v2624_v2  ;;  %v2728_v55 = vsel %vm2492_vm11, -1000000.0, %v2702_v57 }
 0x5f4   :  { %v2741_v46 = vsel %vm891_vm2, %v2725_v3, -inf  ;;  %v2750_v50 = vsel %vm891_vm2, %v2728_v55, -inf }
 0x5f5   :  { %2742 = vmax.xlane.f32.xlu1 %v2741_v46 }
 0x5f6   :  { %v2676_v25 = vpop.f32.mrf.mxu3 }
 0x5f7   :  { %v2727_v5 = vsel %vm2491_vm10, -1000000.0, %v2676_v25 }
 0x5f8   :  { %v2747_v22 = vsel %vm891_vm2, %v2727_v5, -inf }
 0x5f9   :  { %2748 = vmax.xlane.f32.xlu0 %v2747_v22  ;;  %v2650_v41 = vpop.f32.mrf.mxu2 }
 0x5fa   :  { %v2726_v6 = vsel %vm2490_vm12, -1000000.0, %v2650_v41 }
 0x5fb   :  { %v2744_v8 = vsel %vm891_vm2, %v2726_v6, -inf }
 0x5fc   :  { %2745 = vmax.xlane.f32.xlu2 %v2744_v8 }
 0x601   :  { %2751 = vmax.xlane.f32.xlu0 %v2750_v50 }
 0x654   :  { %v2737_v34 = vpop.xlane.xlu1 %2736 }
 0x655   :  { %v2755_v0 = vsub.f32 %v2723_v53, %v2737_v34 }
 0x657   :  { %v2765_v12 = vmul.f32 1.442695, %v2755_v0 }
 0x659   :  { %3543 = vpow2.f32 %v2765_v12 }
 0x65a   :  { %v2731_v16 = vpop.xlane.xlu2 %2730 }
 0x65b   :  { %v2753_v19 = vsub.f32 %v2721_v62, %v2731_v16 }
 0x65c   :  { %v2740_v20 = vpop.xlane.xlu1 %2739 }
 0x65d   :  { %v2761_v29 = vmul.f32 1.442695, %v2753_v19  ;;  %v2756_v11 = vsub.f32 %v2724_v61, %v2740_v20 }
 0x65f   :  { %v3544_v31 = vpop.eup %3543  ;;  %3545 = vpow2.f32 %v2761_v29  ;;  %v2767_v32 = vmul.f32 1.442695, %v2756_v11 }
 0x660   :  { %3436 = vmatmul.msk.f32.vlgmr.msra.gmra.mxu3 %vm891_vm2, %v3544_v31  ;;  %v2967_v43 = vsel %vm891_vm2, %v3544_v31, 0.0 }
 0x661   :  { %3547 = vpow2.f32 %v2767_v32  ;;  %2968 = vadd.xlane.f32.xlu2 %v2967_v43 }
 0x662   :  { %v2734_v26 = vpop.xlane.xlu0 %2733 }
 0x663   :  { %v2754_v18 = vsub.f32 %v2722_v10, %v2734_v26 }
 0x665   :  { %v3546_v42 = vpop.eup %3545  ;;  %v2763_v47 = vmul.f32 1.442695, %v2754_v18 }
 0x666   :  { %3434 = vmatmul.msk.f32.vlgmr.msrb.gmra.mxu1 %vm891_vm2, %v3546_v42  ;;  %v2961_v44 = vsel %vm891_vm2, %v3546_v42, 0.0 }
 0x667   :  { %v3548_v23 = vpop.eup %3547  ;;  %3549 = vpow2.f32 %v2763_v47  ;;  %2962 = vadd.xlane.f32.xlu1 %v2961_v44 }
 0x668   :  { %3437 = vmatmul.msk.f32.vlgmr.msrb.gmra.mxu0 %vm891_vm2, %v3548_v23  ;;  %v2970_v7 = vsel %vm891_vm2, %v3548_v23, 0.0  ;;  %v2743_v45 = vpop.xlane.xlu1 %2742 }
 0x669   :  { %2971 = vadd.xlane.f32.xlu0 %v2970_v7  ;;  %v2757_v48 = vsub.f32 %v2725_v3, %v2743_v45 }
 0x66b   :  { %v2769_v37 = vmul.f32 1.442695, %v2757_v48 }
 0x66c   :  { %v2749_v35 = vpop.xlane.xlu0 %2748 }
 0x66d   :  { %v3550_v36 = vpop.eup %3549  ;;  %v2759_v33 = vsub.f32 %v2727_v5, %v2749_v35  ;;  %3551 = vpow2.f32 %v2769_v37 }
 0x66e   :  { %3435 = vmatmul.msk.f32.vlgmr.msra.gmra.mxu2 %vm891_vm2, %v3550_v36  ;;  %v2964_v40 = vsel %vm891_vm2, %v3550_v36, 0.0 }
 0x66f   :  { %2965 = vadd.xlane.f32.xlu2 %v2964_v40  ;;  %v2773_v49 = vmul.f32 1.442695, %v2759_v33  ;;  %v2746_v51 = vpop.xlane.xlu2 %2745 }
 0x670   :  { %v2758_v52 = vsub.f32 %v2726_v6, %v2746_v51 }
 0x671   :  { %3553 = vpow2.f32 %v2773_v49 }
 0x672   :  { %v2771_v13 = vmul.f32 1.442695, %v2758_v52 }
 0x673   :  { %v3552_v30 = vpop.eup %3551 }
 0x674   :  { %v2752_v58 = vpop.xlane.xlu0 %2751  ;;  %3555 = vpow2.f32 %v2771_v13  ;;  %3438 = vmatmul.msk.f32.vlgmr.msra.gmra.mxu1 %vm891_vm2, %v3552_v30  ;;  %v2973_v53 = vsel %vm891_vm2, %v3552_v30, 0.0 }
 0x675   :  { %v2760_v28 = vsub.f32 %v2728_v55, %v2752_v58  ;;  %2974 = vadd.xlane.f32.xlu0 %v2973_v53 }
 0x677   :  { %v3554_v14 = vpop.eup %3553  ;;  %v2775_v9 = vmul.f32 1.442695, %v2760_v28 }
 0x678   :  { %3440 = vmatmul.msk.f32.vlgmr.msrb.gmra.mxu3 %vm891_vm2, %v3554_v14  ;;  %v2979_v59 = vsel %vm891_vm2, %v3554_v14, 0.0 }
 0x679   :  { %3557 = vpow2.f32 %v2775_v9  ;;  %2980 = vadd.xlane.f32.xlu1 %v2979_v59 }
 0x67a   :  { %v3556_v61 = vpop.eup %3555 }
 0x67b   :  { %3439 = vmatmul.msk.f32.vlgmr.msrb.gmra.mxu2 %vm891_vm2, %v3556_v61  ;;  %v2976_v63 = vsel %vm891_vm2, %v3556_v61, 0.0 }
 0x67f   :  { %v3558_v62 = vpop.eup %3557 }
 0x680   :  { %3441 = vmatmul.msk.f32.vlgmr.msra.gmra.mxu0 %vm891_vm2, %v3558_v62  ;;  %v2982_v54 = vsel %vm891_vm2, %v3558_v62, 0.0 }
 0x681   :  { %2977 = vadd.xlane.f32.xlu1 %v2976_v63  ;;  %2983 = vadd.xlane.f32.xlu2 %v2982_v54 }
 0x6d4   :  { %v2969_v38 = vpop.xlane.xlu2 %2968 }
 0x6d5   :  { %3559 = vrcp.f32 %v2969_v38 }
 0x6da   :  { %v2963_v60 = vpop.xlane.xlu1 %2962 }
 0x6db   :  { %3561 = vrcp.f32 %v2963_v60  ;;  %v3560_v21 = vpop.eup %3559 }
 0x6dc   :  { %v2972_v39 = vpop.xlane.xlu0 %2971 }
 0x6dd   :  { %3563 = vrcp.f32 %v2972_v39 }
 0x6e1   :  { %v3562_v46 = vpop.eup %3561 }
 0x6e2   :  { %v2966_v3 = vpop.xlane.xlu2 %2965 }
 0x6e3   :  { %v2843_v10 = vpop.f32.mrf.mxu3  ;;  %v2797_v2 = vpop.f32.mrf.mxu1  ;;  %3565 = vrcp.f32 %v2966_v3 }
 0x6e4   :  { %v2995_v1 = vmul.f32 %v3560_v21, %v2843_v10  ;;  %v2993_v56 = vmul.f32 %v3562_v46, %v2797_v2  ;;  %v3564_v5 = vpop.eup %3563 }
 0x6e5   :  { %v2866_v25 = vpop.f32.mrf.mxu0 }
 0x6e6   :  { %v3001_v4 = vrot.slane %v2995_v1, 4  ;;  %v3003_v57 = vrot.slane %v2993_v56, 4  ;;  %v2996_v6 = vmul.f32 %v3564_v5, %v2866_v25 }
 0x6e8   :  { %v3002_v41 = vsel %vm179_vm1, %v3001_v4, %v2993_v56  ;;  %v2975_v8 = vpop.xlane.xlu0 %2974  ;;  %v3004_v55 = vsel %vm179_vm1, %v2995_v1, %v3003_v57  ;;  %v3013_v12 = vrot.slane %v2996_v6, 4 }
 0x6e9   :  { %v3566_v50 = vpop.eup %3565  ;;  %v3008_v34 = vperm.slane %v3002_v41, %v3879_v15  ;;  %3567 = vrcp.f32 %v2975_v8  ;;  %v3012_v19 = vperm.slane %v3004_v55, %v3879_v15 }
 0x6eb   :  { %v3027_v11 = vrot.slane %v3008_v34, 4  ;;  %v3039_v18 = vrot.slane %v3012_v19, 4 }
 0x6ec   :  { %v2981_v22 = vpop.xlane.xlu1 %2980 }
 0x6ed   :  { %3569 = vrcp.f32 %v2981_v22 }
 0x6ef   :  { %v3568_v7 = vpop.eup %3567 }
 0x6f1   :  { %v2820_v0 = vpop.f32.mrf.mxu2  ;;  %v2889_v26 = vpop.f32.mrf.mxu1 }
 0x6f2   :  { %v2994_v16 = vmul.f32 %v3566_v50, %v2820_v0  ;;  %v2997_v35 = vmul.f32 %v3568_v7, %v2889_v26 }
 0x6f3   :  { %v3570_v52 = vpop.eup %3569 }
 0x6f4   :  { %v3014_v20 = vsel %vm179_vm1, %v3013_v12, %v2994_v16  ;;  %v3015_v29 = vrot.slane %v2994_v16, 4  ;;  %v2984_v32 = vpop.xlane.xlu2 %2983  ;;  %v2978_v23 = vpop.xlane.xlu1 %2977  ;;  %v3059_v59 = vrot.slane %v2997_v35, 4 }
 0x6f5   :  { %v3020_v31 = vperm.slane %v3014_v20, %v3879_v15  ;;  %3571 = vrcp.f32 %v2984_v32 }
 0x6f6   :  { %v3016_v43 = vsel %vm179_vm1, %v2996_v6, %v3015_v29  ;;  %3573 = vrcp.f32 %v2978_v23 }
 0x6f7   :  { %v3024_v42 = vperm.slane %v3016_v43, %v3879_v15  ;;  %v3025_v47 = vrot.slane %v3020_v31, 4  ;;  %v3028_v44 = vsel %vm179_vm1, %v3020_v31, %v3027_v11 }
 0x6f8   :  { %v3036_v45 = vperm.slane %v3028_v44, %v3886_v24 }
 0x6f9   :  { %v3026_v48 = vsel %vm179_vm1, %v3025_v47, %v3008_v34  ;;  %v3037_v36 = vrot.slane %v3024_v42, 4  ;;  %v3040_v37 = vsel %vm179_vm1, %v3024_v42, %v3039_v18 }
 0x6fa   :  { %v3032_v40 = vperm.slane %v3026_v48, %v3886_v24  ;;  %v3048_v33 = vperm.slane %v3040_v37, %v3886_v24  ;;  %v3051_v49 = vrot.slane %v3036_v45, 4 }
 0x6fb   :  { %v3038_v51 = vsel %vm179_vm1, %v3037_v36, %v3012_v19  ;;  %v2935_v53 = vpop.f32.mrf.mxu3  ;;  %v3572_v62 = vpop.eup %3571 }
 0x6fc   :  { %v3044_v13 = vperm.slane %v3038_v51, %v3886_v24  ;;  %v3049_v30 = vrot.slane %v3032_v40, 4  ;;  %v3052_v58 = vsel %vm179_vm1, 0.0, %v3051_v49  ;;  %v3055_v28 = vrot.slane %v3048_v33, 4  ;;  %v3574_v3 = vpop.eup %3573 }
 0x6fd   :  { %v3113_v14 = vsel %vm179_vm1, %v3051_v49, %v3032_v40  ;;  %v3118_v9 = vrot.slane %v3052_v58, 4  ;;  %v2999_v61 = vmul.f32 %v3570_v52, %v2935_v53  ;;  %v2958_v54 = vpop.f32.mrf.mxu0 }
 0x6fe   :  { %v3056_v63 = vsel %vm179_vm1, 0.0, %v3055_v28  ;;  %v3050_v38 = vsel %vm179_vm1, 0.0, %v3049_v30  ;;  %v3053_v60 = vrot.slane %v3044_v13, 4  ;;  %v3117_v10 = vperm.slane %v3113_v14, %v3879_v15  ;;  %v2912_v56 = vpop.f32.mrf.mxu2 }
 0x6ff   :  { %v3129_v39 = vrot.slane %v3056_v63, 4  ;;  %v3057_v21 = vrot.slane %v2999_v61, 4  ;;  %v3060_v1 = vsel %vm179_vm1, %v2999_v61, %v3059_v59  ;;  %v3000_v2 = vmul.f32 %v3572_v62, %v2958_v54 }
 0x700   :  { %v3068_v46 = vperm.slane %v3060_v1, %v3879_v15  ;;  %v3054_v4 = vsel %vm179_vm1, 0.0, %v3053_v60  ;;  %v3119_v25 = vsel %vm179_vm1, %v3118_v9, %v3050_v38  ;;  %v3124_v5 = vsel %vm179_vm1, %v3055_v28, %v3044_v13 }
 0x701   :  { %v3058_v22 = vsel %vm179_vm1, %v3057_v21, %v2997_v35  ;;  %v3069_v57 = vrot.slane %v3000_v2, 4  ;;  %v2998_v41 = vmul.f32 %v3574_v3, %v2912_v56  ;;  %v3123_v6 = vperm.slane %v3119_v25, %v3879_v15 }
 0x702   :  { %v3064_v8 = vperm.slane %v3058_v22, %v3879_v15  ;;  %v3128_v55 = vperm.slane %v3124_v5, %v3879_v15  ;;  %v3130_v50 = vsel %vm179_vm1, %v3129_v39, %v3054_v4  ;;  %v3137_v16 = vrot.slane %v3117_v10, 4 }
 0x703   :  { %v3070_v34 = vsel %vm179_vm1, %v3069_v57, %v2998_v41  ;;  %v3071_v0 = vrot.slane %v2998_v41, 4  ;;  %v3134_v12 = vperm.slane %v3130_v50, %v3879_v15  ;;  %v3135_v11 = vrot.slane %v3123_v6, 4 }
 0x704   :  { %v3083_v19 = vrot.slane %v3064_v8, 4  ;;  %v3076_v20 = vperm.slane %v3070_v34, %v3879_v15  ;;  %v3149_v29 = vrot.slane %v3128_v55, 4  ;;  %v3095_v31 = vrot.slane %v3068_v46, 4 }
 0x705   :  { %v3072_v32 = vsel %vm179_vm1, %v3000_v2, %v3071_v0  ;;  %v3138_v43 = vsel %vm179_vm1, %v3123_v6, %v3137_v16  ;;  %v3147_v26 = vrot.slane %v3134_v12, 4  ;;  %v3136_v45 = vsel %vm179_vm1, %v3135_v11, %v3117_v10 }
 0x706   :  { %v3080_v18 = vperm.slane %v3072_v32, %v3879_v15  ;;  %v3081_v42 = vrot.slane %v3076_v20, 4  ;;  %v3084_v47 = vsel %vm179_vm1, %v3076_v20, %v3083_v19  ;;  %v3146_v44 = vperm.slane %v3138_v43, %v3886_v24 }
 0x707   :  { %v3092_v23 = vperm.slane %v3084_v47, %v3886_v24  ;;  %v3150_v7 = vsel %vm179_vm1, %v3134_v12, %v3149_v29  ;;  %v3148_v48 = vsel %vm179_vm1, %v3147_v26, %v3128_v55  ;;  %v3142_v58 = vperm.slane %v3136_v45, %v3886_v24  ;;  %v3283_v45 = vld [vmem:[#allocation10 + $0x18] sm:$0xff] }
 0x708   :  { %v3082_v36 = vsel %vm179_vm1, %v3081_v42, %v3064_v8  ;;  %v3093_v37 = vrot.slane %v3080_v18, 4  ;;  %v3096_v35 = vsel %vm179_vm1, %v3080_v18, %v3095_v31  ;;  %v3158_v40 = vperm.slane %v3150_v7, %v3886_v24  ;;  %v2493_v7 = vld [vmem:[#allocation8] sm:$0xff]  ;;  %3306 = vmatpush.msra.mxu2 %v3283_v45 }
 0x709   :  { %v3088_v33 = vperm.slane %v3082_v36, %v3886_v24  ;;  %v3104_v49 = vperm.slane %v3096_v35, %v3886_v24  ;;  %v3107_v51 = vrot.slane %v3092_v23, 4  ;;  %v3165_v52 = vrot.slane %v3146_v44, 4  ;;  %v2494_v23 = vld [vmem:[#allocation8 + $0x8] sm:$0xff] }
 0x70a   :  { %v3094_v13 = vsel %vm179_vm1, %v3093_v37, %v3068_v46  ;;  %v3163_v30 = vrot.slane %v3158_v40, 4  ;;  %v3154_v28 = vperm.slane %v3148_v48, %v3886_v24  ;;  %v3161_v10 = vrot.slane %v3142_v58, 4  ;;  %v3282_v48 = vld [vmem:[#allocation10 + $0x10] sm:$0xff] }
 0x70b   :  { %v3100_v53 = vperm.slane %v3094_v13, %v3886_v24  ;;  %v3105_v14 = vrot.slane %v3088_v33, 4  ;;  %v3108_v9 = vsel %vm179_vm1, 0.0, %v3107_v51  ;;  %v3111_v59 = vrot.slane %v3104_v49, 4  ;;  %3307 = vmatpush.msra.mxu2 %v3282_v48 }
 0x70c   :  { %v3172_v61 = vrot.slane %v3108_v9, 4  ;;  %v3166_v62 = vsel %vm179_vm1, %v3158_v40, %v3165_v52  ;;  %v3164_v63 = vsel %vm179_vm1, %v3163_v30, %v3146_v44  ;;  %v3159_v54 = vrot.slane %v3154_v28, 4  ;;  %v2496_v44 = vld [vmem:[#allocation8 + $0x18] sm:$0xff] }
 0x70d   :  { %v3109_v38 = vrot.slane %v3100_v53, 4  ;;  %v3112_v60 = vsel %vm179_vm1, 0.0, %v3111_v59  ;;  %3239 = vrot.lane.b32.xlu1 %v3166_v62, %s3744_s20  ;;  %3231 = vrot.lane.b32.xlu2 %v3164_v63, %s3743_s19  ;;  %v3106_v39 = vsel %vm179_vm1, 0.0, %v3105_v14  ;;  %v3167_v1 = vsel %vm179_vm1, %v3107_v51, %v3088_v33  ;;  %v3280_v14 = vld [vmem:[#allocation10] sm:$0xff]  ;;  %v3326_v9 = vld [vmem:[%s4910_s10 + $0x38] sm:$0xff] }
 0x70e   :  { %v3183_v21 = vrot.slane %v3112_v60, 4  ;;  %v3173_v2 = vsel %vm179_vm1, %v3172_v61, %v3106_v39  ;;  %v3178_v3 = vsel %vm179_vm1, %v3111_v59, %v3100_v53  ;;  %v3162_v46 = vsel %vm179_vm1, %v3154_v28, %v3161_v10  ;;  %3269 = vmatpush.msrb.mxu1 %v2496_v44  ;;  %v3281_v53 = vld [vmem:[#allocation10 + $0x8] sm:$0xff]  ;;  %v3325_v59 = vld [vmem:[%s4910_s10 + $0x30] sm:$0xff]  ;;  %3346 = vmatpush.msra.mxu3 %v3326_v9  ;;  %v3323_v62 = vld [vmem:[%s4910_s10 + $0x20] sm:$0xff] }
 0x70f   :  { %v3110_v56 = vsel %vm179_vm1, 0.0, %v3109_v38  ;;  %v3171_v4 = vperm.slane %v3167_v1, %v3879_v15  ;;  %v3177_v25 = vperm.slane %v3173_v2, %v3879_v15  ;;  %3223 = vrot.lane.b32.xlu0 %v3162_v46, %s3731_s30  ;;  %v3182_v5 = vperm.slane %v3178_v3, %v3879_v15  ;;  %3308 = vmatpush.msra.mxu2 %v3281_v53  ;;  %v3324_v61 = vld [vmem:[%s4910_s10 + $0x28] sm:$0xff]  ;;  %v3322_v63 = vld [vmem:[%s4910_s10 + $0x18] sm:$0xff]  ;;  %v3321_v39 = vld [vmem:[%s4910_s10 + $0x10] sm:$0xff] }
 0x710   :  { %v3184_v22 = vsel %vm179_vm1, %v3183_v21, %v3110_v56  ;;  %v3160_v57 = vsel %vm179_vm1, %v3159_v54, %v3142_v58  ;;  %3347 = vmatpush.msra.mxu3 %v3325_v59  ;;  %v3320_v21 = vld [vmem:[%s4910_s10 + $0x8] sm:$0xff] }
 0x711   :  { %v3188_v41 = vperm.slane %v3184_v22, %v3879_v15  ;;  %v3191_v6 = vrot.slane %v3171_v4, 4  ;;  %v3189_v8 = vrot.slane %v3177_v25, 4  ;;  %v3203_v55 = vrot.slane %v3182_v5, 4  ;;  %3309 = vmatpush.msra.mxu2 %v3280_v14 }
 0x712   :  { %3348 = vmatpush.msra.mxu3 %v3324_v61 }
 0x713   :  { %v3190_v50 = vsel %vm179_vm1, %v3189_v8, %v3171_v4  ;;  %v3201_v34 = vrot.slane %v3188_v41, 4  ;;  %v3192_v0 = vsel %vm179_vm1, %v3177_v25, %v3191_v6  ;;  %v3204_v12 = vsel %vm179_vm1, %v3188_v41, %v3203_v55  ;;  %v3510_v25 = vld [vmem:[%s4911_s11] ss:$0 sm:$0xff] }
 0x714   :  { %v3196_v16 = vperm.slane %v3190_v50, %v3886_v24  ;;  %v3212_v19 = vperm.slane %v3204_v12, %v3886_v24  ;;  %v3200_v15 = vperm.slane %v3192_v0, %v3886_v24  ;;  %3349 = vmatpush.msra.mxu3 %v3323_v62 }
 0x715   :  { %v3202_v20 = vsel %vm179_vm1, %v3201_v34, %v3182_v5 }
 0x716   :  { %v3208_v29 = vperm.slane %v3202_v20, %v3886_v24  ;;  %v3215_v11 = vrot.slane %v3196_v16, 4  ;;  %v3217_v31 = vrot.slane %v3212_v19, 4  ;;  %v3219_v42 = vrot.slane %v3200_v15, 4  ;;  %v2495_v24 = vld [vmem:[#allocation8 + $0x10] sm:$0xff]  ;;  %3350 = vmatpush.msra.mxu3 %v3322_v63 }
 0x717   :  { %3270 = vmatpush.msrb.mxu1 %v2495_v24 }
 0x718   :  { %v3213_v32 = vrot.slane %v3208_v29, 4  ;;  %v3216_v43 = vsel %vm179_vm1, %v3208_v29, %v3215_v11  ;;  %v3218_v26 = vsel %vm179_vm1, %v3217_v31, %v3200_v15  ;;  %v3220_v47 = vsel %vm179_vm1, %v3212_v19, %v3219_v42  ;;  %3351 = vmatpush.msra.mxu3 %v3321_v39 }
 0x719   :  { %3225 = vrot.lane.b32.xlu0 %v3216_v43, %s3731_s30  ;;  %3233 = vrot.lane.b32.xlu2 %v3218_v26, %s3743_s19 }
 0x71a   :  { %v3214_v18 = vsel %vm179_vm1, %v3213_v32, %v3196_v16  ;;  %3271 = vmatpush.msrb.mxu1 %v2494_v23  ;;  %3352 = vmatpush.msra.mxu3 %v3320_v21 }
 0x71c   :  { %3272 = vmatpush.msrb.mxu1 %v2493_v7 }
 0x721   :  { %3241 = vrot.lane.b32.xlu0 %v3220_v47, %s3744_s20 }
 0x767   :  { %v3232_v37 = vpop.permute.xlu2 %3231 }
 0x773   :  { %v3234_v13 = vpop.permute.xlu2 %3233 }
 0x77f   :  { %v3240_v40 = vpop.permute.xlu1 %3239 }
 0x781   :  { %v3224_v36 = vpop.permute.xlu0 %3223 }
 0x782   :  { %v3245_v35 = vsel %vm891_vm2, %v3160_v57, %v3224_v36 }
 0x783   :  { %v3247_v33 = vsel %vm1618_vm3, %v3245_v35, %v3232_v37 }
 0x784   :  { %v3249_v49 = vsel %vm1621_vm4, %v3247_v33, %v3240_v40 }
 0x785   :  { %3442 = vmatmul.msk.f32.vlgmr.msrb.gmra.mxu1 %vm128_vm0, %v3249_v49 }
 0x78b   :  { %v3226_v51 = vpop.permute.xlu0 %3225 }
 0x78c   :  { %v3246_v52 = vsel %vm891_vm2, %v3214_v18, %v3226_v51 }
 0x78d   :  { %v3248_v58 = vsel %vm1618_vm3, %v3246_v52, %v3234_v13 }
 0x793   :  { %v3242_v30 = vpop.permute.xlu0 %3241 }
 0x794   :  { %v3250_v28 = vsel %vm1621_vm4, %v3248_v58, %v3242_v30 }
 0x795   :  { %3443 = vmatmul.msk.f32.gmra.mxu1 %vm128_vm0, %v3250_v28 }
 0x802   :  { %v3274_v54 = vpop.f32.mrf.mxu1 }
 0x803   :  { %v3275_v38 = vadd.f32 %v3274_v54, %v4395_v17  ;;  %v3319_v17 = vld [vmem:[%s4910_s10] sm:$0xff] }
 0x804   :  { %3353 = vmatpush.msra.mxu3 %v3319_v17 }
 0x805   :  { %3444 = vmatmul.msk.f32.vlgmr.msra.gmra.mxu2 %vm128_vm0, %v3275_v38 }
 0x812   :  { %v3277_v60 = vpop.f32.mrf.mxu1 }
 0x813   :  { %v3278_v10 = vadd.f32 %v3277_v60, %v4399_v27  ;;  %v3509_v27 = vld [vmem:[%s4909_s9] ss:$0 sm:$0xff]  ;;  %s3746_s9 = smov [#allocation11]  }
 0x814   :  { %s3369_s10 = sshll.u32 %s3746_s9, 4  ;;  %s3370_s10 = int_to_ptr.vmem [resolvable:$true] %s3369_s10 }
 0x815   :  { %3445 = vmatmul.msk.f32.gmra.mxu2 %vm128_vm0, %v3278_v10 }
 0x888   :  { %v3311_v1 = vpop.f32.mrf.mxu2 }
 0x889   :  { %v3312_v2 = vadd.f32 %v3509_v27, %v3311_v1 }
 0x88b   :  { %v3317_v3 = vmax.f32 %v3312_v2, 0.0 }
 0x88d   :  { %3446 = vmatmul.msk.f32.vlgmr.msra.gmra.mxu3 %vm3331_vm13, %v3317_v3 }
 0x898   :  { %v3314_v46 = vpop.f32.mrf.mxu2 }
 0x899   :  { %v3315_v56 = vadd.f32 %v3509_v27, %v3314_v46 }
 0x89b   :  { %v3318_v4 = vmax.f32 %v3315_v56, 0.0 }
 0x89d   :  { %3447 = vmatmul.msk.f32.gmra.mxu3 %vm3331_vm13, %v3318_v4 }
 0x910   :  { %v3355_v5 = vpop.f32.mrf.mxu3 }
 0x911   :  { %v3356_v22 = vadd.f32 %v3510_v25, %v3355_v5 }
 0x913   :  { %v3361_v57 = vadd.f32 %v3356_v22, %v3275_v38 }
 0x915   :  { %3363 = vst.msk [vmem:[#allocation11] sm:$0xff] %vm128_vm0, %v3361_v57 }
 0x920   :  { %v3358_v41 = vpop.f32.mrf.mxu3 }
 0x921   :  { %v3359_v6 = vadd.f32 %v3510_v25, %v3358_v41 }
 0x923   :  { %v3362_v8 = vadd.f32 %v3359_v6, %v3278_v10 }
 0x925   :  { %3364 = vst.msk [vmem:[#allocation11 + $0x8] sm:$0xff] %vm128_vm0, %v3362_v8 }
 0x926   :  { %3377 = dma.vmem_to_hbm [thread:$0]  %s3370_s10, 256, %s3372_s16, [#allocation4], %s3730_s29, %s3730_s29, %s3731_s30  }
 0x927   :  { %3727 = dma.done.wait [#allocation4], 256  }
 0x928   :  { %3728 = vsyncadd [#allocation4], 4294967040 }
 0x929   :  { %3382 = vsyncpa [#allocation3], 1 }
 0x92a   :  { %3383 = vsyncpa [#allocation6], 1 }
 0x92b   :  { %3384 = vsyncpa [#allocation9], 1 }
 0x92c   :  { %3385 = vsyncpa [#allocation4], 1 }

</bundles_post_ra>
